<compile_context>
chip_gen: v7x
topology: tpu7x:2x2x1
jax: 0.10.0
libtpu: 0.0.40
codegen_flags: <defaults>
</compile_context>

<pallas_src>
import jax
import jax.numpy as jnp
from jax.experimental import pallas as pl
from jax.experimental.pallas import tpu as pltpu

# ----------------------------- config (small synthetic BERT) -----------------
BATCH = 2
SEQ = 8
BS = BATCH * SEQ          # folded batch*seq rows
HIDDEN = 32
NUM_HEADS = 4
HEAD_DIM = HIDDEN // NUM_HEADS
INTERMEDIATE = 64
NUM_LAYERS = 2
VOCAB = 100
MAX_POS = 16
TYPE_VOCAB = 2
NUM_LABELS = 2
LN_EPS = 1e-12
SLAB_W = 128              # lane-dense width for packed bias/LayerNorm slabs
OUT_W = 128               # lane-dense padded logits width


# ----------------------------- math helpers (f32 elementwise) ----------------
def _layernorm(x, gamma, beta):
    mu = jnp.mean(x, axis=-1, keepdims=True)
    var = jnp.mean((x - mu) ** 2, axis=-1, keepdims=True)
    return (x - mu) * jax.lax.rsqrt(var + LN_EPS) * gamma + beta


def _gelu(x):
    # TODO(synk): tanh-approximate GELU; exact-erf nn.GELU() differs slightly.
    return 0.5 * x * (1.0 + jnp.tanh(0.7978845608028654 * (x + 0.044715 * x * x * x)))


# ----------------------------- fused kernel ----------------------------------
def fused_bert_kernel(ids_ref,                                     # SMEM scalar prefetch
                      we_ref, pt_ref, mask_ref, gslab_ref,
                      wqkv_ref, wo_ref, wi_ref, wo2_ref, lslab_ref,
                      pw_ref, cw1_ref, cw2_ref,
                      out_ref,
                      xbuf_ref, ctx_ref):
    H, NH, D, I, L, S = HIDDEN, NUM_HEADS, HEAD_DIM, INTERMEDIATE, NUM_LAYERS, SEQ

    # global packed slab rows: [emb_ln_g, emb_ln_b, pooler_b, cls_b1, cls_b2(128-wide)]
    gs = gslab_ref[...]                       # (8, 128) f32
    emb_g, emb_b = gs[0:1, :H], gs[1:2, :H]
    pool_b, cls_b1 = gs[2:3, :H], gs[3:4, :H]
    cls_b2 = gs[4:5, :]                       # (1, 128), zero-padded past NUM_LABELS

    # ---- in-kernel embedding gather: word row (dynamic) + (pos+type) row ----
    for t in range(BS):
        idx = ids_ref[t]
        xbuf_ref[pl.ds(t, 1), :] = (we_ref[pl.ds(idx, 1), :]
                                    + pt_ref[pl.ds(t % S, 1), :])

    x = _layernorm(xbuf_ref[...], emb_g, emb_b)        # (BS, H) f32

    mask2d = mask_ref[...]                             # (BS, BS) additive, built once
    scale = 1.0 / (HEAD_DIM ** 0.5)
    dn = (((1,), (1,)), ((), ()))                      # q·kᵀ without materializing kᵀ

    # ---- encoder layers: static unroll, weights resident in VMEM ----
    for l in range(L):
        sl = lslab_ref[l]                              # (8, 128) f32 bias/LN slab
        bqkv, bo = sl[0:1, :3 * H], sl[1:2, :H]
        ln1g, ln1b = sl[2:3, :H], sl[3:4, :H]
        bi, bo2 = sl[4:5, :I], sl[5:6, :H]
        ln2g, ln2b = sl[6:7, :H], sl[7:8, :H]

        # fused QKV projection: one (BS,H)@(H,3H) bf16 matmul, f32 accumulate
        qkv = jnp.dot(x.astype(jnp.bfloat16), wqkv_ref[l],
                      preferred_element_type=jnp.float32) + bqkv
        q = qkv[:, 0:H] * scale                        # scale applied once
        k = qkv[:, H:2 * H]
        v = qkv[:, 2 * H:3 * H]

        # per-head attention; contexts written straight into VMEM scratch (no concat)
        for h in range(NH):
            lo = h * D
            s_h = jax.lax.dot_general(q[:, lo:lo + D], k[:, lo:lo + D],
                                      dimension_numbers=dn,
                                      preferred_element_type=jnp.float32) + mask2d
            # max-subtraction dropped: post-scale scores are tiny, masked entries
            # underflow exp() to 0, and every row keeps the unmasked CLS key.
            p = jnp.exp(s_h)
            p = p * pl.reciprocal(jnp.sum(p, axis=-1, keepdims=True), approx=True)
            ctx_ref[:, lo:lo + D] = jnp.dot(p, v[:, lo:lo + D],
                                            preferred_element_type=jnp.float32)

        attn = jnp.dot(ctx_ref[...].astype(jnp.bfloat16), wo_ref[l],
                       preferred_element_type=jnp.float32) + bo
        x1 = _layernorm(x + attn, ln1g, ln1b)

        ffn = _gelu(jnp.dot(x1.astype(jnp.bfloat16), wi_ref[l],
                            preferred_element_type=jnp.float32) + bi)
        ffn = jnp.dot(ffn.astype(jnp.bfloat16), wo2_ref[l],
                      preferred_element_type=jnp.float32) + bo2
        x = _layernorm(x1 + ffn, ln2g, ln2b)

    # ---- pooler + MLPHead classifier, run over all rows (lane-dense);
    #      wrapper picks CLS rows 0 and SEQ and the first NUM_LABELS columns.
    pooled = jnp.tanh(jnp.dot(x.astype(jnp.bfloat16), pw_ref[...],
                              preferred_element_type=jnp.float32) + pool_b)
    h1 = jnp.maximum(jnp.dot(pooled.astype(jnp.bfloat16), cw1_ref[...],
                             preferred_element_type=jnp.float32) + cls_b1, 0.0)
    # TODO(synk): classifier dropout (p=0.5) is identity at inference; no RNG applied.
    out_ref[...] = jnp.dot(h1.astype(jnp.bfloat16), cw2_ref[...],
                           preferred_element_type=jnp.float32) + cls_b2


# ----------------------------- parameter init --------------------------------
def _pad_row(v, width=SLAB_W):
    r = jnp.zeros((width,), jnp.float32)
    return r.at[: v.shape[0]].set(v.astype(jnp.float32))


def init_params(key):
    keys = iter(jax.random.split(key, 64))
    H, I, L = HIDDEN, INTERMEDIATE, NUM_LAYERS

    def w(shape, scale=0.02):
        return (scale * jax.random.normal(next(keys), shape)).astype(jnp.float32)

    wqkv, wo, wi, wo2, lslabs = [], [], [], [], []
    for _ in range(L):
        wqkv.append(jnp.concatenate([w((H, H)), w((H, H)), w((H, H))], axis=1))
        wo.append(w((H, H)))
        wi.append(w((H, I)))
        wo2.append(w((I, H)))
        # packed slab rows: bqkv(3H), bo, ln1_g, ln1_b, bi(I), bo2, ln2_g, ln2_b
        rows = [jnp.zeros((3 * H,)), jnp.zeros((H,)), jnp.ones((H,)),
                jnp.zeros((H,)), jnp.zeros((I,)), jnp.zeros((H,)),
                jnp.ones((H,)), jnp.zeros((H,))]
        lslabs.append(jnp.stack([_pad_row(r) for r in rows]))

    # global slab rows: emb_ln_g, emb_ln_b, pooler_b, cls_b1, cls_b2, pad x3
    grows = [jnp.ones((H,)), jnp.zeros((H,)), jnp.zeros((H,)),
             jnp.zeros((H,)), jnp.zeros((NUM_LABELS,)),
             jnp.zeros((1,)), jnp.zeros((1,)), jnp.zeros((1,))]
    gslab = jnp.stack([_pad_row(r) for r in grows])      # (8, 128) f32

    # classifier output weight padded to a lane-dense 128-wide slab
    cls_w2 = jnp.zeros((H, OUT_W), jnp.float32).at[:, :NUM_LABELS].set(
        w((H, NUM_LABELS)))

    return {
        'word_emb': w((VOCAB, H)),
        'pos_emb': w((MAX_POS, H)),
        'type_emb': w((TYPE_VOCAB, H)),
        'gslab': gslab,
        'wqkv': jnp.stack(wqkv).astype(jnp.bfloat16),    # (L, H, 3H)
        'wo': jnp.stack(wo).astype(jnp.bfloat16),        # (L, H, H)
        'wi': jnp.stack(wi).astype(jnp.bfloat16),        # (L, H, I)
        'wo2': jnp.stack(wo2).astype(jnp.bfloat16),      # (L, I, H)
        'lslab': jnp.stack(lslabs),                      # (L, 8, 128) f32
        'pooler_w': w((H, H)).astype(jnp.bfloat16),
        'cls_w1': w((H, H)).astype(jnp.bfloat16),
        'cls_w2': cls_w2.astype(jnp.bfloat16),           # (H, 128)
    }


# ----------------------------- cost model -------------------------------------
def _flops_and_transcendentals():
    per_layer = (2 * BS * HIDDEN * 3 * HIDDEN                 # fused QKV
                 + NUM_HEADS * 2 * (2 * BS * BS * HEAD_DIM)   # scores + ctx
                 + 2 * BS * HIDDEN * HIDDEN                   # output proj
                 + 2 * 2 * BS * HIDDEN * INTERMEDIATE)        # FFN in + out
    head = 2 * (2 * BS * HIDDEN * HIDDEN) + 2 * BS * HIDDEN * OUT_W
    flops = NUM_LAYERS * per_layer + head
    transcend = (NUM_LAYERS * (NUM_HEADS * BS * BS + BS * INTERMEDIATE)
                 + BS * HIDDEN)
    return flops, transcend


# ----------------------------- forward ----------------------------------------
@jax.jit
def bert_sentiment_forward(params, input_ids, attention_mask):
    ids = input_ids.reshape(-1).astype(jnp.int32)                    # (B*S,)

    # TODO(synk): token_type_ids assumed all-zero (matches BertModel default).
    pos_type = params['pos_emb'][:SEQ] + params['type_emb'][0][None, :]   # (S,H)

    # block-diagonal additive mask over the folded (B*S, B*S) score matrix
    m = attention_mask.astype(jnp.float32)                           # (B, S)
    key_add = ((1.0 - m) * -1e9).reshape(1, BS)                      # per-key
    grp = jnp.arange(BS, dtype=jnp.int32) // SEQ
    cross = jnp.where(grp[:, None] == grp[None, :], 0.0, -1e9)       # cross-batch
    add_mask = cross + key_add                                       # (BS, BS)

    operands = (ids, params['word_emb'], pos_type, add_mask, params['gslab'],
                params['wqkv'], params['wo'], params['wi'], params['wo2'],
                params['lslab'], params['pooler_w'], params['cls_w1'],
                params['cls_w2'])

    flops, transcend = _flops_and_transcendentals()
    bytes_acc = sum(int(a.size) * a.dtype.itemsize for a in operands) \
        + BS * OUT_W * 4

    out_full = pl.pallas_call(
        fused_bert_kernel,
        out_shape=jax.ShapeDtypeStruct((BS, OUT_W), jnp.float32),
        grid_spec=pltpu.PrefetchScalarGridSpec(
            num_scalar_prefetch=1,                       # input_ids -> SMEM
            grid=(1,),                                   # single program, no pipeline
            in_specs=[
                pl.BlockSpec(params['word_emb'].shape, lambda i, ids: (0, 0)),
                pl.BlockSpec((SEQ, HIDDEN), lambda i, ids: (0, 0)),
                pl.BlockSpec((BS, BS), lambda i, ids: (0, 0)),
                pl.BlockSpec(params['gslab'].shape, lambda i, ids: (0, 0)),
                pl.BlockSpec(params['wqkv'].shape, lambda i, ids: (0, 0, 0)),
                pl.BlockSpec(params['wo'].shape, lambda i, ids: (0, 0, 0)),
                pl.BlockSpec(params['wi'].shape, lambda i, ids: (0, 0, 0)),
                pl.BlockSpec(params['wo2'].shape, lambda i, ids: (0, 0, 0)),
                pl.BlockSpec(params['lslab'].shape, lambda i, ids: (0, 0, 0)),
                pl.BlockSpec(params['pooler_w'].shape, lambda i, ids: (0, 0)),
                pl.BlockSpec(params['cls_w1'].shape, lambda i, ids: (0, 0)),
                pl.BlockSpec(params['cls_w2'].shape, lambda i, ids: (0, 0)),
            ],
            out_specs=pl.BlockSpec((BS, OUT_W), lambda i, ids: (0, 0)),
            scratch_shapes=[pltpu.VMEM((BS, HIDDEN), jnp.float32),   # embed buffer
                            pltpu.VMEM((BS, HIDDEN), jnp.float32)],  # attn context
        ),
        compiler_params=pltpu.CompilerParams(
            dimension_semantics=("arbitrary",)),
        cost_estimate=pl.CostEstimate(flops=flops,
                                      transcendentals=transcend,
                                      bytes_accessed=bytes_acc),
    )(*operands)

    # CLS token of batch b sits at flattened row b*SEQ; logits in first NUM_LABELS lanes
    return out_full[::SEQ, :NUM_LABELS]


# ----------------------------- main -------------------------------------------
if __name__ == "__main__":
    key = jax.random.PRNGKey(0)
    k_param, k_ids = jax.random.split(key)

    params = init_params(k_param)
    input_ids = jax.random.randint(k_ids, (BATCH, SEQ), 0, VOCAB, dtype=jnp.int32)
    attention_mask = jnp.ones((BATCH, SEQ), jnp.int32)

    logits = bert_sentiment_forward(params, input_ids, attention_mask)
    jax.block_until_ready(logits)
    assert logits.shape == (BATCH, NUM_LABELS)
    assert bool(jnp.all(jnp.isfinite(logits)))
    print("KERNEL_OK")
</pallas_src>

<mosaic_0001>
module attributes {stable_mosaic.version = 11 : i64} {
  func.func @fused_bert_kernel(%arg0: i32, %arg1: memref<16xi32, #tpu.memory_space<smem>>, %arg2: memref<100x32xf32, #tpu.memory_space<vmem>>, %arg3: memref<8x32xf32, #tpu.memory_space<vmem>>, %arg4: memref<16x16xf32, #tpu.memory_space<vmem>>, %arg5: memref<8x128xf32, #tpu.memory_space<vmem>>, %arg6: memref<2x32x96xbf16, #tpu.memory_space<vmem>>, %arg7: memref<2x32x32xbf16, #tpu.memory_space<vmem>>, %arg8: memref<2x32x64xbf16, #tpu.memory_space<vmem>>, %arg9: memref<2x64x32xbf16, #tpu.memory_space<vmem>>, %arg10: memref<2x8x128xf32, #tpu.memory_space<vmem>>, %arg11: memref<32x32xbf16, #tpu.memory_space<vmem>>, %arg12: memref<32x32xbf16, #tpu.memory_space<vmem>>, %arg13: memref<32x128xbf16, #tpu.memory_space<vmem>>, %arg14: memref<16x128xf32, #tpu.memory_space<vmem>>, %arg15: memref<16x32xf32, #tpu.memory_space<vmem>>, %arg16: memref<16x32xf32, #tpu.memory_space<vmem>>) attributes {dimension_semantics = [#tpu.dimension_semantics<arbitrary>], iteration_bounds = array<i64: 1>, scalar_prefetch = 1 : i64, scratch_operands = 2 : i64, tpu.core_type = #tpu.core_type<tc>, window_params = [{pipeline_mode = #tpu.pipeline_mode<synchronous>, transform_indices = @transform_0, window_bounds = array<i64: 100, 32>}, {pipeline_mode = #tpu.pipeline_mode<synchronous>, transform_indices = @transform_1, window_bounds = array<i64: 8, 32>}, {pipeline_mode = #tpu.pipeline_mode<synchronous>, transform_indices = @transform_2, window_bounds = array<i64: 16, 16>}, {pipeline_mode = #tpu.pipeline_mode<synchronous>, transform_indices = @transform_3, window_bounds = array<i64: 8, 128>}, {pipeline_mode = #tpu.pipeline_mode<synchronous>, transform_indices = @transform_4, window_bounds = array<i64: 2, 32, 96>}, {pipeline_mode = #tpu.pipeline_mode<synchronous>, transform_indices = @transform_5, window_bounds = array<i64: 2, 32, 32>}, {pipeline_mode = #tpu.pipeline_mode<synchronous>, transform_indices = @transform_6, window_bounds = array<i64: 2, 32, 64>}, {pipeline_mode = #tpu.pipeline_mode<synchronous>, transform_indices = @transform_7, window_bounds = array<i64: 2, 64, 32>}, {pipeline_mode = #tpu.pipeline_mode<synchronous>, transform_indices = @transform_8, window_bounds = array<i64: 2, 8, 128>}, {pipeline_mode = #tpu.pipeline_mode<synchronous>, transform_indices = @transform_9, window_bounds = array<i64: 32, 32>}, {pipeline_mode = #tpu.pipeline_mode<synchronous>, transform_indices = @transform_10, window_bounds = array<i64: 32, 32>}, {pipeline_mode = #tpu.pipeline_mode<synchronous>, transform_indices = @transform_11, window_bounds = array<i64: 32, 128>}, {pipeline_mode = #tpu.pipeline_mode<synchronous>, transform_indices = @transform_12, window_bounds = array<i64: 16, 128>}]} {
    %c0 = arith.constant 0 : index
    %c0_0 = arith.constant 0 : index
    %0 = vector.load %arg5[%c0, %c0_0] : memref<8x128xf32, #tpu.memory_space<vmem>>, vector<8x128xf32>
    %1 = vector.extract_strided_slice %0 {offsets = [0, 0], sizes = [1, 32], strides = [1, 1]} : vector<8x128xf32> to vector<1x32xf32>
    %2 = vector.extract_strided_slice %0 {offsets = [1, 0], sizes = [1, 32], strides = [1, 1]} : vector<8x128xf32> to vector<1x32xf32>
    %3 = vector.extract_strided_slice %0 {offsets = [2, 0], sizes = [1, 32], strides = [1, 1]} : vector<8x128xf32> to vector<1x32xf32>
    %4 = vector.extract_strided_slice %0 {offsets = [3, 0], sizes = [1, 32], strides = [1, 1]} : vector<8x128xf32> to vector<1x32xf32>
    %5 = vector.extract_strided_slice %0 {offsets = [4, 0], sizes = [1, 128], strides = [1, 1]} : vector<8x128xf32> to vector<1x128xf32>
    %c0_1 = arith.constant 0 : index
    %6 = memref.load %arg1[%c0_1] : memref<16xi32, #tpu.memory_space<smem>>
    %7 = arith.index_cast %6 : i32 to index
    %c0_2 = arith.constant 0 : index
    %8 = vector.load %arg2[%7, %c0_2] : memref<100x32xf32, #tpu.memory_space<vmem>>, vector<1x32xf32>
    %c0_3 = arith.constant 0 : index
    %c0_4 = arith.constant 0 : index
    %9 = vector.load %arg3[%c0_3, %c0_4] : memref<8x32xf32, #tpu.memory_space<vmem>>, vector<1x32xf32>
    %10 = arith.addf %8, %9 : vector<1x32xf32>
    %c0_5 = arith.constant 0 : index
    %c0_6 = arith.constant 0 : index
    %11 = vector.load %arg15[%c0_5, %c0_6] : memref<16x32xf32, #tpu.memory_space<vmem>>, vector<1x32xf32>
    tpu.vector_store %arg15[%c0_5, %c0_6], %10 {strides = array<i32>} : memref<16x32xf32, #tpu.memory_space<vmem>>, vector<1x32xf32>,
    %c1 = arith.constant 1 : index
    %12 = memref.load %arg1[%c1] : memref<16xi32, #tpu.memory_space<smem>>
    %13 = arith.index_cast %12 : i32 to index
    %c0_7 = arith.constant 0 : index
    %14 = vector.load %arg2[%13, %c0_7] : memref<100x32xf32, #tpu.memory_space<vmem>>, vector<1x32xf32>
    %c1_8 = arith.constant 1 : index
    %c0_9 = arith.constant 0 : index
    %15 = vector.load %arg3[%c1_8, %c0_9] : memref<8x32xf32, #tpu.memory_space<vmem>>, vector<1x32xf32>
    %16 = arith.addf %14, %15 : vector<1x32xf32>
    %c1_10 = arith.constant 1 : index
    %c0_11 = arith.constant 0 : index
    %17 = vector.load %arg15[%c1_10, %c0_11] : memref<16x32xf32, #tpu.memory_space<vmem>>, vector<1x32xf32>
    tpu.vector_store %arg15[%c1_10, %c0_11], %16 {strides = array<i32>} : memref<16x32xf32, #tpu.memory_space<vmem>>, vector<1x32xf32>,
    %c2 = arith.constant 2 : index
    %18 = memref.load %arg1[%c2] : memref<16xi32, #tpu.memory_space<smem>>
    %19 = arith.index_cast %18 : i32 to index
    %c0_12 = arith.constant 0 : index
    %20 = vector.load %arg2[%19, %c0_12] : memref<100x32xf32, #tpu.memory_space<vmem>>, vector<1x32xf32>
    %c2_13 = arith.constant 2 : index
    %c0_14 = arith.constant 0 : index
    %21 = vector.load %arg3[%c2_13, %c0_14] : memref<8x32xf32, #tpu.memory_space<vmem>>, vector<1x32xf32>
    %22 = arith.addf %20, %21 : vector<1x32xf32>
    %c2_15 = arith.constant 2 : index
    %c0_16 = arith.constant 0 : index
    %23 = vector.load %arg15[%c2_15, %c0_16] : memref<16x32xf32, #tpu.memory_space<vmem>>, vector<1x32xf32>
    tpu.vector_store %arg15[%c2_15, %c0_16], %22 {strides = array<i32>} : memref<16x32xf32, #tpu.memory_space<vmem>>, vector<1x32xf32>,
    %c3 = arith.constant 3 : index
    %24 = memref.load %arg1[%c3] : memref<16xi32, #tpu.memory_space<smem>>
    %25 = arith.index_cast %24 : i32 to index
    %c0_17 = arith.constant 0 : index
    %26 = vector.load %arg2[%25, %c0_17] : memref<100x32xf32, #tpu.memory_space<vmem>>, vector<1x32xf32>
    %c3_18 = arith.constant 3 : index
    %c0_19 = arith.constant 0 : index
    %27 = vector.load %arg3[%c3_18, %c0_19] : memref<8x32xf32, #tpu.memory_space<vmem>>, vector<1x32xf32>
    %28 = arith.addf %26, %27 : vector<1x32xf32>
    %c3_20 = arith.constant 3 : index
    %c0_21 = arith.constant 0 : index
    %29 = vector.load %arg15[%c3_20, %c0_21] : memref<16x32xf32, #tpu.memory_space<vmem>>, vector<1x32xf32>
    tpu.vector_store %arg15[%c3_20, %c0_21], %28 {strides = array<i32>} : memref<16x32xf32, #tpu.memory_space<vmem>>, vector<1x32xf32>,
    %c4 = arith.constant 4 : index
    %30 = memref.load %arg1[%c4] : memref<16xi32, #tpu.memory_space<smem>>
    %31 = arith.index_cast %30 : i32 to index
    %c0_22 = arith.constant 0 : index
    %32 = vector.load %arg2[%31, %c0_22] : memref<100x32xf32, #tpu.memory_space<vmem>>, vector<1x32xf32>
    %c4_23 = arith.constant 4 : index
    %c0_24 = arith.constant 0 : index
    %33 = vector.load %arg3[%c4_23, %c0_24] : memref<8x32xf32, #tpu.memory_space<vmem>>, vector<1x32xf32>
    %34 = arith.addf %32, %33 : vector<1x32xf32>
    %c4_25 = arith.constant 4 : index
    %c0_26 = arith.constant 0 : index
    %35 = vector.load %arg15[%c4_25, %c0_26] : memref<16x32xf32, #tpu.memory_space<vmem>>, vector<1x32xf32>
    tpu.vector_store %arg15[%c4_25, %c0_26], %34 {strides = array<i32>} : memref<16x32xf32, #tpu.memory_space<vmem>>, vector<1x32xf32>,
    %c5 = arith.constant 5 : index
    %36 = memref.load %arg1[%c5] : memref<16xi32, #tpu.memory_space<smem>>
    %37 = arith.index_cast %36 : i32 to index
    %c0_27 = arith.constant 0 : index
    %38 = vector.load %arg2[%37, %c0_27] : memref<100x32xf32, #tpu.memory_space<vmem>>, vector<1x32xf32>
    %c5_28 = arith.constant 5 : index
    %c0_29 = arith.constant 0 : index
    %39 = vector.load %arg3[%c5_28, %c0_29] : memref<8x32xf32, #tpu.memory_space<vmem>>, vector<1x32xf32>
    %40 = arith.addf %38, %39 : vector<1x32xf32>
    %c5_30 = arith.constant 5 : index
    %c0_31 = arith.constant 0 : index
    %41 = vector.load %arg15[%c5_30, %c0_31] : memref<16x32xf32, #tpu.memory_space<vmem>>, vector<1x32xf32>
    tpu.vector_store %arg15[%c5_30, %c0_31], %40 {strides = array<i32>} : memref<16x32xf32, #tpu.memory_space<vmem>>, vector<1x32xf32>,
    %c6 = arith.constant 6 : index
    %42 = memref.load %arg1[%c6] : memref<16xi32, #tpu.memory_space<smem>>
    %43 = arith.index_cast %42 : i32 to index
    %c0_32 = arith.constant 0 : index
    %44 = vector.load %arg2[%43, %c0_32] : memref<100x32xf32, #tpu.memory_space<vmem>>, vector<1x32xf32>
    %c6_33 = arith.constant 6 : index
    %c0_34 = arith.constant 0 : index
    %45 = vector.load %arg3[%c6_33, %c0_34] : memref<8x32xf32, #tpu.memory_space<vmem>>, vector<1x32xf32>
    %46 = arith.addf %44, %45 : vector<1x32xf32>
    %c6_35 = arith.constant 6 : index
    %c0_36 = arith.constant 0 : index
    %47 = vector.load %arg15[%c6_35, %c0_36] : memref<16x32xf32, #tpu.memory_space<vmem>>, vector<1x32xf32>
    tpu.vector_store %arg15[%c6_35, %c0_36], %46 {strides = array<i32>} : memref<16x32xf32, #tpu.memory_space<vmem>>, vector<1x32xf32>,
    %c7 = arith.constant 7 : index
    %48 = memref.load %arg1[%c7] : memref<16xi32, #tpu.memory_space<smem>>
    %49 = arith.index_cast %48 : i32 to index
    %c0_37 = arith.constant 0 : index
    %50 = vector.load %arg2[%49, %c0_37] : memref<100x32xf32, #tpu.memory_space<vmem>>, vector<1x32xf32>
    %c7_38 = arith.constant 7 : index
    %c0_39 = arith.constant 0 : index
    %51 = vector.load %arg3[%c7_38, %c0_39] : memref<8x32xf32, #tpu.memory_space<vmem>>, vector<1x32xf32>
    %52 = arith.addf %50, %51 : vector<1x32xf32>
    %c7_40 = arith.constant 7 : index
    %c0_41 = arith.constant 0 : index
    %53 = vector.load %arg15[%c7_40, %c0_41] : memref<16x32xf32, #tpu.memory_space<vmem>>, vector<1x32xf32>
    tpu.vector_store %arg15[%c7_40, %c0_41], %52 {strides = array<i32>} : memref<16x32xf32, #tpu.memory_space<vmem>>, vector<1x32xf32>,
    %c8 = arith.constant 8 : index
    %54 = memref.load %arg1[%c8] : memref<16xi32, #tpu.memory_space<smem>>
    %55 = arith.index_cast %54 : i32 to index
    %c0_42 = arith.constant 0 : index
    %56 = vector.load %arg2[%55, %c0_42] : memref<100x32xf32, #tpu.memory_space<vmem>>, vector<1x32xf32>
    %c0_43 = arith.constant 0 : index
    %c0_44 = arith.constant 0 : index
    %57 = vector.load %arg3[%c0_43, %c0_44] : memref<8x32xf32, #tpu.memory_space<vmem>>, vector<1x32xf32>
    %58 = arith.addf %56, %57 : vector<1x32xf32>
    %c8_45 = arith.constant 8 : index
    %c0_46 = arith.constant 0 : index
    %59 = vector.load %arg15[%c8_45, %c0_46] : memref<16x32xf32, #tpu.memory_space<vmem>>, vector<1x32xf32>
    tpu.vector_store %arg15[%c8_45, %c0_46], %58 {strides = array<i32>} : memref<16x32xf32, #tpu.memory_space<vmem>>, vector<1x32xf32>,
    %c9 = arith.constant 9 : index
    %60 = memref.load %arg1[%c9] : memref<16xi32, #tpu.memory_space<smem>>
    %61 = arith.index_cast %60 : i32 to index
    %c0_47 = arith.constant 0 : index
    %62 = vector.load %arg2[%61, %c0_47] : memref<100x32xf32, #tpu.memory_space<vmem>>, vector<1x32xf32>
    %c1_48 = arith.constant 1 : index
    %c0_49 = arith.constant 0 : index
    %63 = vector.load %arg3[%c1_48, %c0_49] : memref<8x32xf32, #tpu.memory_space<vmem>>, vector<1x32xf32>
    %64 = arith.addf %62, %63 : vector<1x32xf32>
    %c9_50 = arith.constant 9 : index
    %c0_51 = arith.constant 0 : index
    %65 = vector.load %arg15[%c9_50, %c0_51] : memref<16x32xf32, #tpu.memory_space<vmem>>, vector<1x32xf32>
    tpu.vector_store %arg15[%c9_50, %c0_51], %64 {strides = array<i32>} : memref<16x32xf32, #tpu.memory_space<vmem>>, vector<1x32xf32>,
    %c10 = arith.constant 10 : index
    %66 = memref.load %arg1[%c10] : memref<16xi32, #tpu.memory_space<smem>>
    %67 = arith.index_cast %66 : i32 to index
    %c0_52 = arith.constant 0 : index
    %68 = vector.load %arg2[%67, %c0_52] : memref<100x32xf32, #tpu.memory_space<vmem>>, vector<1x32xf32>
    %c2_53 = arith.constant 2 : index
    %c0_54 = arith.constant 0 : index
    %69 = vector.load %arg3[%c2_53, %c0_54] : memref<8x32xf32, #tpu.memory_space<vmem>>, vector<1x32xf32>
    %70 = arith.addf %68, %69 : vector<1x32xf32>
    %c10_55 = arith.constant 10 : index
    %c0_56 = arith.constant 0 : index
    %71 = vector.load %arg15[%c10_55, %c0_56] : memref<16x32xf32, #tpu.memory_space<vmem>>, vector<1x32xf32>
    tpu.vector_store %arg15[%c10_55, %c0_56], %70 {strides = array<i32>} : memref<16x32xf32, #tpu.memory_space<vmem>>, vector<1x32xf32>,
    %c11 = arith.constant 11 : index
    %72 = memref.load %arg1[%c11] : memref<16xi32, #tpu.memory_space<smem>>
    %73 = arith.index_cast %72 : i32 to index
    %c0_57 = arith.constant 0 : index
    %74 = vector.load %arg2[%73, %c0_57] : memref<100x32xf32, #tpu.memory_space<vmem>>, vector<1x32xf32>
    %c3_58 = arith.constant 3 : index
    %c0_59 = arith.constant 0 : index
    %75 = vector.load %arg3[%c3_58, %c0_59] : memref<8x32xf32, #tpu.memory_space<vmem>>, vector<1x32xf32>
    %76 = arith.addf %74, %75 : vector<1x32xf32>
    %c11_60 = arith.constant 11 : index
    %c0_61 = arith.constant 0 : index
    %77 = vector.load %arg15[%c11_60, %c0_61] : memref<16x32xf32, #tpu.memory_space<vmem>>, vector<1x32xf32>
    tpu.vector_store %arg15[%c11_60, %c0_61], %76 {strides = array<i32>} : memref<16x32xf32, #tpu.memory_space<vmem>>, vector<1x32xf32>,
    %c12 = arith.constant 12 : index
    %78 = memref.load %arg1[%c12] : memref<16xi32, #tpu.memory_space<smem>>
    %79 = arith.index_cast %78 : i32 to index
    %c0_62 = arith.constant 0 : index
    %80 = vector.load %arg2[%79, %c0_62] : memref<100x32xf32, #tpu.memory_space<vmem>>, vector<1x32xf32>
    %c4_63 = arith.constant 4 : index
    %c0_64 = arith.constant 0 : index
    %81 = vector.load %arg3[%c4_63, %c0_64] : memref<8x32xf32, #tpu.memory_space<vmem>>, vector<1x32xf32>
    %82 = arith.addf %80, %81 : vector<1x32xf32>
    %c12_65 = arith.constant 12 : index
    %c0_66 = arith.constant 0 : index
    %83 = vector.load %arg15[%c12_65, %c0_66] : memref<16x32xf32, #tpu.memory_space<vmem>>, vector<1x32xf32>
    tpu.vector_store %arg15[%c12_65, %c0_66], %82 {strides = array<i32>} : memref<16x32xf32, #tpu.memory_space<vmem>>, vector<1x32xf32>,
    %c13 = arith.constant 13 : index
    %84 = memref.load %arg1[%c13] : memref<16xi32, #tpu.memory_space<smem>>
    %85 = arith.index_cast %84 : i32 to index
    %c0_67 = arith.constant 0 : index
    %86 = vector.load %arg2[%85, %c0_67] : memref<100x32xf32, #tpu.memory_space<vmem>>, vector<1x32xf32>
    %c5_68 = arith.constant 5 : index
    %c0_69 = arith.constant 0 : index
    %87 = vector.load %arg3[%c5_68, %c0_69] : memref<8x32xf32, #tpu.memory_space<vmem>>, vector<1x32xf32>
    %88 = arith.addf %86, %87 : vector<1x32xf32>
    %c13_70 = arith.constant 13 : index
    %c0_71 = arith.constant 0 : index
    %89 = vector.load %arg15[%c13_70, %c0_71] : memref<16x32xf32, #tpu.memory_space<vmem>>, vector<1x32xf32>
    tpu.vector_store %arg15[%c13_70, %c0_71], %88 {strides = array<i32>} : memref<16x32xf32, #tpu.memory_space<vmem>>, vector<1x32xf32>,
    %c14 = arith.constant 14 : index
    %90 = memref.load %arg1[%c14] : memref<16xi32, #tpu.memory_space<smem>>
    %91 = arith.index_cast %90 : i32 to index
    %c0_72 = arith.constant 0 : index
    %92 = vector.load %arg2[%91, %c0_72] : memref<100x32xf32, #tpu.memory_space<vmem>>, vector<1x32xf32>
    %c6_73 = arith.constant 6 : index
    %c0_74 = arith.constant 0 : index
    %93 = vector.load %arg3[%c6_73, %c0_74] : memref<8x32xf32, #tpu.memory_space<vmem>>, vector<1x32xf32>
    %94 = arith.addf %92, %93 : vector<1x32xf32>
    %c14_75 = arith.constant 14 : index
    %c0_76 = arith.constant 0 : index
    %95 = vector.load %arg15[%c14_75, %c0_76] : memref<16x32xf32, #tpu.memory_space<vmem>>, vector<1x32xf32>
    tpu.vector_store %arg15[%c14_75, %c0_76], %94 {strides = array<i32>} : memref<16x32xf32, #tpu.memory_space<vmem>>, vector<1x32xf32>,
    %c15 = arith.constant 15 : index
    %96 = memref.load %arg1[%c15] : memref<16xi32, #tpu.memory_space<smem>>
    %97 = arith.index_cast %96 : i32 to index
    %c0_77 = arith.constant 0 : index
    %98 = vector.load %arg2[%97, %c0_77] : memref<100x32xf32, #tpu.memory_space<vmem>>, vector<1x32xf32>
    %c7_78 = arith.constant 7 : index
    %c0_79 = arith.constant 0 : index
    %99 = vector.load %arg3[%c7_78, %c0_79] : memref<8x32xf32, #tpu.memory_space<vmem>>, vector<1x32xf32>
    %100 = arith.addf %98, %99 : vector<1x32xf32>
    %c15_80 = arith.constant 15 : index
    %c0_81 = arith.constant 0 : index
    %101 = vector.load %arg15[%c15_80, %c0_81] : memref<16x32xf32, #tpu.memory_space<vmem>>, vector<1x32xf32>
    tpu.vector_store %arg15[%c15_80, %c0_81], %100 {strides = array<i32>} : memref<16x32xf32, #tpu.memory_space<vmem>>, vector<1x32xf32>,
    %c0_82 = arith.constant 0 : index
    %c0_83 = arith.constant 0 : index
    %102 = vector.load %arg15[%c0_82, %c0_83] : memref<16x32xf32, #tpu.memory_space<vmem>>, vector<16x32xf32>
    %cst = arith.constant dense<0.000000e+00> : vector<16xf32>
    %103 = vector.multi_reduction <add>, %102, %cst [1] : vector<16x32xf32> to vector<16xf32>
    %104 = vector.shape_cast %103 : vector<16xf32> to vector<16x1xf32>
    %cst_84 = arith.constant 3.200000e+01 : f32
    %105 = vector.broadcast %cst_84 : f32 to vector<16x1xf32>
    %106 = arith.divf %104, %105 : vector<16x1xf32>
    %107 = vector.broadcast %106 : vector<16x1xf32> to vector<16x32xf32>
    %108 = arith.subf %102, %107 : vector<16x32xf32>
    %109 = arith.mulf %108, %108 : vector<16x32xf32>
    %cst_85 = arith.constant dense<0.000000e+00> : vector<16xf32>
    %110 = vector.multi_reduction <add>, %109, %cst_85 [1] : vector<16x32xf32> to vector<16xf32>
    %111 = vector.shape_cast %110 : vector<16xf32> to vector<16x1xf32>
    %cst_86 = arith.constant 3.200000e+01 : f32
    %112 = vector.broadcast %cst_86 : f32 to vector<16x1xf32>
    %113 = arith.divf %111, %112 : vector<16x1xf32>
    %114 = vector.broadcast %106 : vector<16x1xf32> to vector<16x32xf32>
    %115 = arith.subf %102, %114 : vector<16x32xf32>
    %cst_87 = arith.constant 9.99999996E-13 : f32
    %116 = vector.broadcast %cst_87 : f32 to vector<16x1xf32>
    %117 = arith.addf %113, %116 : vector<16x1xf32>
    %118 = math.rsqrt %117 : vector<16x1xf32>
    %119 = vector.broadcast %118 : vector<16x1xf32> to vector<16x32xf32>
    %120 = arith.mulf %115, %119 : vector<16x32xf32>
    %121 = vector.broadcast %1 : vector<1x32xf32> to vector<16x32xf32>
    %122 = arith.mulf %120, %121 : vector<16x32xf32>
    %123 = vector.broadcast %2 : vector<1x32xf32> to vector<16x32xf32>
    %124 = arith.addf %122, %123 : vector<16x32xf32>
    %c0_88 = arith.constant 0 : index
    %c0_89 = arith.constant 0 : index
    %125 = vector.load %arg4[%c0_88, %c0_89] : memref<16x16xf32, #tpu.memory_space<vmem>>, vector<16x16xf32>
    %c0_90 = arith.constant 0 : index
    %c0_91 = arith.constant 0 : index
    %c0_92 = arith.constant 0 : index
    %126 = vector.load %arg10[%c0_90, %c0_91, %c0_92] : memref<2x8x128xf32, #tpu.memory_space<vmem>>, vector<1x8x128xf32>
    %127 = vector.shape_cast %126 : vector<1x8x128xf32> to vector<8x128xf32>
    %128 = vector.extract_strided_slice %127 {offsets = [0, 0], sizes = [1, 96], strides = [1, 1]} : vector<8x128xf32> to vector<1x96xf32>
    %129 = vector.extract_strided_slice %127 {offsets = [1, 0], sizes = [1, 32], strides = [1, 1]} : vector<8x128xf32> to vector<1x32xf32>
    %130 = vector.extract_strided_slice %127 {offsets = [2, 0], sizes = [1, 32], strides = [1, 1]} : vector<8x128xf32> to vector<1x32xf32>
    %131 = vector.extract_strided_slice %127 {offsets = [3, 0], sizes = [1, 32], strides = [1, 1]} : vector<8x128xf32> to vector<1x32xf32>
    %132 = vector.extract_strided_slice %127 {offsets = [4, 0], sizes = [1, 64], strides = [1, 1]} : vector<8x128xf32> to vector<1x64xf32>
    %133 = vector.extract_strided_slice %127 {offsets = [5, 0], sizes = [1, 32], strides = [1, 1]} : vector<8x128xf32> to vector<1x32xf32>
    %134 = vector.extract_strided_slice %127 {offsets = [6, 0], sizes = [1, 32], strides = [1, 1]} : vector<8x128xf32> to vector<1x32xf32>
    %135 = vector.extract_strided_slice %127 {offsets = [7, 0], sizes = [1, 32], strides = [1, 1]} : vector<8x128xf32> to vector<1x32xf32>
    %136 = arith.truncf %124 : vector<16x32xf32> to vector<16x32xbf16>
    %c0_93 = arith.constant 0 : index
    %c0_94 = arith.constant 0 : index
    %c0_95 = arith.constant 0 : index
    %137 = vector.load %arg6[%c0_93, %c0_94, %c0_95] : memref<2x32x96xbf16, #tpu.memory_space<vmem>>, vector<1x32x96xbf16>
    %138 = vector.shape_cast %137 : vector<1x32x96xbf16> to vector<32x96xbf16>
    %cst_96 = arith.constant dense<0.000000e+00> : vector<16x96xf32>
    %139 = tpu.matmul %136, %138, %cst_96 {dimension_numbers = #tpu.dot_dimension_numbers<[1], [0], [0], [1], [0, 0, 1, 1], [], []>} : vector<16x32xbf16>, vector<32x96xbf16>, vector<16x96xf32> -> vector<16x96xf32>
    %140 = vector.broadcast %128 : vector<1x96xf32> to vector<16x96xf32>
    %141 = arith.addf %139, %140 : vector<16x96xf32>
    %142 = vector.extract_strided_slice %141 {offsets = [0, 0], sizes = [16, 32], strides = [1, 1]} : vector<16x96xf32> to vector<16x32xf32>
    %cst_97 = arith.constant 0.353553385 : f32
    %143 = vector.broadcast %cst_97 : f32 to vector<16x32xf32>
    %144 = arith.mulf %142, %143 : vector<16x32xf32>
    %145 = vector.extract_strided_slice %141 {offsets = [0, 32], sizes = [16, 32], strides = [1, 1]} : vector<16x96xf32> to vector<16x32xf32>
    %146 = vector.extract_strided_slice %141 {offsets = [0, 64], sizes = [16, 32], strides = [1, 1]} : vector<16x96xf32> to vector<16x32xf32>
    %147 = vector.extract_strided_slice %144 {offsets = [0, 0], sizes = [16, 8], strides = [1, 1]} : vector<16x32xf32> to vector<16x8xf32>
    %148 = vector.extract_strided_slice %145 {offsets = [0, 0], sizes = [16, 8], strides = [1, 1]} : vector<16x32xf32> to vector<16x8xf32>
    %cst_98 = arith.constant dense<0.000000e+00> : vector<16x16xf32>
    %149 = tpu.matmul %147, %148, %cst_98 {dimension_numbers = #tpu.dot_dimension_numbers<[1], [1], [0], [0], [0, 0, 1, 0], [], []>} : vector<16x8xf32>, vector<16x8xf32>, vector<16x16xf32> -> vector<16x16xf32>
    %150 = arith.addf %149, %125 : vector<16x16xf32>
    %151 = math.exp %150 : vector<16x16xf32>
    %cst_99 = arith.constant dense<0.000000e+00> : vector<16xf32>
    %152 = vector.multi_reduction <add>, %151, %cst_99 [1] : vector<16x16xf32> to vector<16xf32>
    %153 = vector.shape_cast %152 : vector<16xf32> to vector<16x1xf32>
    %154 = tpu.reciprocal %153 {approx = true} : vector<16x1xf32> -> vector<16x1xf32>
    %155 = vector.broadcast %154 : vector<16x1xf32> to vector<16x16xf32>
    %156 = arith.mulf %151, %155 : vector<16x16xf32>
    %157 = vector.extract_strided_slice %146 {offsets = [0, 0], sizes = [16, 8], strides = [1, 1]} : vector<16x32xf32> to vector<16x8xf32>
    %cst_100 = arith.constant dense<0.000000e+00> : vector<16x8xf32>
    %158 = tpu.matmul %156, %157, %cst_100 {dimension_numbers = #tpu.dot_dimension_numbers<[1], [0], [0], [1], [0, 0, 1, 1], [], []>} : vector<16x16xf32>, vector<16x8xf32>, vector<16x8xf32> -> vector<16x8xf32>
    %c0_101 = arith.constant 0 : index
    %c0_102 = arith.constant 0 : index
    %159 = vector.load %arg16[%c0_101, %c0_102] : memref<16x32xf32, #tpu.memory_space<vmem>>, vector<16x8xf32>
    tpu.vector_store %arg16[%c0_101, %c0_102], %158 {strides = array<i32>} : memref<16x32xf32, #tpu.memory_space<vmem>>, vector<16x8xf32>,
    %160 = vector.extract_strided_slice %144 {offsets = [0, 8], sizes = [16, 8], strides = [1, 1]} : vector<16x32xf32> to vector<16x8xf32>
    %161 = vector.extract_strided_slice %145 {offsets = [0, 8], sizes = [16, 8], strides = [1, 1]} : vector<16x32xf32> to vector<16x8xf32>
    %cst_103 = arith.constant dense<0.000000e+00> : vector<16x16xf32>
    %162 = tpu.matmul %160, %161, %cst_103 {dimension_numbers = #tpu.dot_dimension_numbers<[1], [1], [0], [0], [0, 0, 1, 0], [], []>} : vector<16x8xf32>, vector<16x8xf32>, vector<16x16xf32> -> vector<16x16xf32>
    %163 = arith.addf %162, %125 : vector<16x16xf32>
    %164 = math.exp %163 : vector<16x16xf32>
    %cst_104 = arith.constant dense<0.000000e+00> : vector<16xf32>
    %165 = vector.multi_reduction <add>, %164, %cst_104 [1] : vector<16x16xf32> to vector<16xf32>
    %166 = vector.shape_cast %165 : vector<16xf32> to vector<16x1xf32>
    %167 = tpu.reciprocal %166 {approx = true} : vector<16x1xf32> -> vector<16x1xf32>
    %168 = vector.broadcast %167 : vector<16x1xf32> to vector<16x16xf32>
    %169 = arith.mulf %164, %168 : vector<16x16xf32>
    %170 = vector.extract_strided_slice %146 {offsets = [0, 8], sizes = [16, 8], strides = [1, 1]} : vector<16x32xf32> to vector<16x8xf32>
    %cst_105 = arith.constant dense<0.000000e+00> : vector<16x8xf32>
    %171 = tpu.matmul %169, %170, %cst_105 {dimension_numbers = #tpu.dot_dimension_numbers<[1], [0], [0], [1], [0, 0, 1, 1], [], []>} : vector<16x16xf32>, vector<16x8xf32>, vector<16x8xf32> -> vector<16x8xf32>
    %c0_106 = arith.constant 0 : index
    %c8_107 = arith.constant 8 : index
    %172 = vector.load %arg16[%c0_106, %c8_107] : memref<16x32xf32, #tpu.memory_space<vmem>>, vector<16x8xf32>
    tpu.vector_store %arg16[%c0_106, %c8_107], %171 {strides = array<i32>} : memref<16x32xf32, #tpu.memory_space<vmem>>, vector<16x8xf32>,
    %173 = vector.extract_strided_slice %144 {offsets = [0, 16], sizes = [16, 8], strides = [1, 1]} : vector<16x32xf32> to vector<16x8xf32>
    %174 = vector.extract_strided_slice %145 {offsets = [0, 16], sizes = [16, 8], strides = [1, 1]} : vector<16x32xf32> to vector<16x8xf32>
    %cst_108 = arith.constant dense<0.000000e+00> : vector<16x16xf32>
    %175 = tpu.matmul %173, %174, %cst_108 {dimension_numbers = #tpu.dot_dimension_numbers<[1], [1], [0], [0], [0, 0, 1, 0], [], []>} : vector<16x8xf32>, vector<16x8xf32>, vector<16x16xf32> -> vector<16x16xf32>
    %176 = arith.addf %175, %125 : vector<16x16xf32>
    %177 = math.exp %176 : vector<16x16xf32>
    %cst_109 = arith.constant dense<0.000000e+00> : vector<16xf32>
    %178 = vector.multi_reduction <add>, %177, %cst_109 [1] : vector<16x16xf32> to vector<16xf32>
    %179 = vector.shape_cast %178 : vector<16xf32> to vector<16x1xf32>
    %180 = tpu.reciprocal %179 {approx = true} : vector<16x1xf32> -> vector<16x1xf32>
    %181 = vector.broadcast %180 : vector<16x1xf32> to vector<16x16xf32>
    %182 = arith.mulf %177, %181 : vector<16x16xf32>
    %183 = vector.extract_strided_slice %146 {offsets = [0, 16], sizes = [16, 8], strides = [1, 1]} : vector<16x32xf32> to vector<16x8xf32>
    %cst_110 = arith.constant dense<0.000000e+00> : vector<16x8xf32>
    %184 = tpu.matmul %182, %183, %cst_110 {dimension_numbers = #tpu.dot_dimension_numbers<[1], [0], [0], [1], [0, 0, 1, 1], [], []>} : vector<16x16xf32>, vector<16x8xf32>, vector<16x8xf32> -> vector<16x8xf32>
    %c0_111 = arith.constant 0 : index
    %c16 = arith.constant 16 : index
    %185 = vector.load %arg16[%c0_111, %c16] : memref<16x32xf32, #tpu.memory_space<vmem>>, vector<16x8xf32>
    tpu.vector_store %arg16[%c0_111, %c16], %184 {strides = array<i32>} : memref<16x32xf32, #tpu.memory_space<vmem>>, vector<16x8xf32>,
    %186 = vector.extract_strided_slice %144 {offsets = [0, 24], sizes = [16, 8], strides = [1, 1]} : vector<16x32xf32> to vector<16x8xf32>
    %187 = vector.extract_strided_slice %145 {offsets = [0, 24], sizes = [16, 8], strides = [1, 1]} : vector<16x32xf32> to vector<16x8xf32>
    %cst_112 = arith.constant dense<0.000000e+00> : vector<16x16xf32>
    %188 = tpu.matmul %186, %187, %cst_112 {dimension_numbers = #tpu.dot_dimension_numbers<[1], [1], [0], [0], [0, 0, 1, 0], [], []>} : vector<16x8xf32>, vector<16x8xf32>, vector<16x16xf32> -> vector<16x16xf32>
    %189 = arith.addf %188, %125 : vector<16x16xf32>
    %190 = math.exp %189 : vector<16x16xf32>
    %cst_113 = arith.constant dense<0.000000e+00> : vector<16xf32>
    %191 = vector.multi_reduction <add>, %190, %cst_113 [1] : vector<16x16xf32> to vector<16xf32>
    %192 = vector.shape_cast %191 : vector<16xf32> to vector<16x1xf32>
    %193 = tpu.reciprocal %192 {approx = true} : vector<16x1xf32> -> vector<16x1xf32>
    %194 = vector.broadcast %193 : vector<16x1xf32> to vector<16x16xf32>
    %195 = arith.mulf %190, %194 : vector<16x16xf32>
    %196 = vector.extract_strided_slice %146 {offsets = [0, 24], sizes = [16, 8], strides = [1, 1]} : vector<16x32xf32> to vector<16x8xf32>
    %cst_114 = arith.constant dense<0.000000e+00> : vector<16x8xf32>
    %197 = tpu.matmul %195, %196, %cst_114 {dimension_numbers = #tpu.dot_dimension_numbers<[1], [0], [0], [1], [0, 0, 1, 1], [], []>} : vector<16x16xf32>, vector<16x8xf32>, vector<16x8xf32> -> vector<16x8xf32>
    %c0_115 = arith.constant 0 : index
    %c24 = arith.constant 24 : index
    %198 = vector.load %arg16[%c0_115, %c24] : memref<16x32xf32, #tpu.memory_space<vmem>>, vector<16x8xf32>
    tpu.vector_store %arg16[%c0_115, %c24], %197 {strides = array<i32>} : memref<16x32xf32, #tpu.memory_space<vmem>>, vector<16x8xf32>,
    %c0_116 = arith.constant 0 : index
    %c0_117 = arith.constant 0 : index
    %199 = vector.load %arg16[%c0_116, %c0_117] : memref<16x32xf32, #tpu.memory_space<vmem>>, vector<16x32xf32>
    %200 = arith.truncf %199 : vector<16x32xf32> to vector<16x32xbf16>
    %c0_118 = arith.constant 0 : index
    %c0_119 = arith.constant 0 : index
    %c0_120 = arith.constant 0 : index
    %201 = vector.load %arg7[%c0_118, %c0_119, %c0_120] : memref<2x32x32xbf16, #tpu.memory_space<vmem>>, vector<1x32x32xbf16>
    %202 = vector.shape_cast %201 : vector<1x32x32xbf16> to vector<32x32xbf16>
    %cst_121 = arith.constant dense<0.000000e+00> : vector<16x32xf32>
    %203 = tpu.matmul %200, %202, %cst_121 {dimension_numbers = #tpu.dot_dimension_numbers<[1], [0], [0], [1], [0, 0, 1, 1], [], []>} : vector<16x32xbf16>, vector<32x32xbf16>, vector<16x32xf32> -> vector<16x32xf32>
    %204 = vector.broadcast %129 : vector<1x32xf32> to vector<16x32xf32>
    %205 = arith.addf %203, %204 : vector<16x32xf32>
    %206 = arith.addf %124, %205 : vector<16x32xf32>
    %cst_122 = arith.constant dense<0.000000e+00> : vector<16xf32>
    %207 = vector.multi_reduction <add>, %206, %cst_122 [1] : vector<16x32xf32> to vector<16xf32>
    %208 = vector.shape_cast %207 : vector<16xf32> to vector<16x1xf32>
    %cst_123 = arith.constant 3.200000e+01 : f32
    %209 = vector.broadcast %cst_123 : f32 to vector<16x1xf32>
    %210 = arith.divf %208, %209 : vector<16x1xf32>
    %211 = vector.broadcast %210 : vector<16x1xf32> to vector<16x32xf32>
    %212 = arith.subf %206, %211 : vector<16x32xf32>
    %213 = arith.mulf %212, %212 : vector<16x32xf32>
    %cst_124 = arith.constant dense<0.000000e+00> : vector<16xf32>
    %214 = vector.multi_reduction <add>, %213, %cst_124 [1] : vector<16x32xf32> to vector<16xf32>
    %215 = vector.shape_cast %214 : vector<16xf32> to vector<16x1xf32>
    %cst_125 = arith.constant 3.200000e+01 : f32
    %216 = vector.broadcast %cst_125 : f32 to vector<16x1xf32>
    %217 = arith.divf %215, %216 : vector<16x1xf32>
    %218 = vector.broadcast %210 : vector<16x1xf32> to vector<16x32xf32>
    %219 = arith.subf %206, %218 : vector<16x32xf32>
    %cst_126 = arith.constant 9.99999996E-13 : f32
    %220 = vector.broadcast %cst_126 : f32 to vector<16x1xf32>
    %221 = arith.addf %217, %220 : vector<16x1xf32>
    %222 = math.rsqrt %221 : vector<16x1xf32>
    %223 = vector.broadcast %222 : vector<16x1xf32> to vector<16x32xf32>
    %224 = arith.mulf %219, %223 : vector<16x32xf32>
    %225 = vector.broadcast %130 : vector<1x32xf32> to vector<16x32xf32>
    %226 = arith.mulf %224, %225 : vector<16x32xf32>
    %227 = vector.broadcast %131 : vector<1x32xf32> to vector<16x32xf32>
    %228 = arith.addf %226, %227 : vector<16x32xf32>
    %229 = arith.truncf %228 : vector<16x32xf32> to vector<16x32xbf16>
    %c0_127 = arith.constant 0 : index
    %c0_128 = arith.constant 0 : index
    %c0_129 = arith.constant 0 : index
    %230 = vector.load %arg8[%c0_127, %c0_128, %c0_129] : memref<2x32x64xbf16, #tpu.memory_space<vmem>>, vector<1x32x64xbf16>
    %231 = vector.shape_cast %230 : vector<1x32x64xbf16> to vector<32x64xbf16>
    %cst_130 = arith.constant dense<0.000000e+00> : vector<16x64xf32>
    %232 = tpu.matmul %229, %231, %cst_130 {dimension_numbers = #tpu.dot_dimension_numbers<[1], [0], [0], [1], [0, 0, 1, 1], [], []>} : vector<16x32xbf16>, vector<32x64xbf16>, vector<16x64xf32> -> vector<16x64xf32>
    %233 = vector.broadcast %132 : vector<1x64xf32> to vector<16x64xf32>
    %234 = arith.addf %232, %233 : vector<16x64xf32>
    %cst_131 = arith.constant 5.000000e-01 : f32
    %235 = vector.broadcast %cst_131 : f32 to vector<16x64xf32>
    %236 = arith.mulf %235, %234 : vector<16x64xf32>
    %cst_132 = arith.constant 4.471500e-02 : f32
    %237 = vector.broadcast %cst_132 : f32 to vector<16x64xf32>
    %238 = arith.mulf %237, %234 : vector<16x64xf32>
    %239 = arith.mulf %238, %234 : vector<16x64xf32>
    %240 = arith.mulf %239, %234 : vector<16x64xf32>
    %241 = arith.addf %234, %240 : vector<16x64xf32>
    %cst_133 = arith.constant 0.797884583 : f32
    %242 = vector.broadcast %cst_133 : f32 to vector<16x64xf32>
    %243 = arith.mulf %242, %241 : vector<16x64xf32>
    %244 = math.tanh %243 : vector<16x64xf32>
    %cst_134 = arith.constant 1.000000e+00 : f32
    %245 = vector.broadcast %cst_134 : f32 to vector<16x64xf32>
    %246 = arith.addf %245, %244 : vector<16x64xf32>
    %247 = arith.mulf %236, %246 : vector<16x64xf32>
    %248 = arith.truncf %247 : vector<16x64xf32> to vector<16x64xbf16>
    %c0_135 = arith.constant 0 : index
    %c0_136 = arith.constant 0 : index
    %c0_137 = arith.constant 0 : index
    %249 = vector.load %arg9[%c0_135, %c0_136, %c0_137] : memref<2x64x32xbf16, #tpu.memory_space<vmem>>, vector<1x64x32xbf16>
    %250 = vector.shape_cast %249 : vector<1x64x32xbf16> to vector<64x32xbf16>
    %cst_138 = arith.constant dense<0.000000e+00> : vector<16x32xf32>
    %251 = tpu.matmul %248, %250, %cst_138 {dimension_numbers = #tpu.dot_dimension_numbers<[1], [0], [0], [1], [0, 0, 1, 1], [], []>} : vector<16x64xbf16>, vector<64x32xbf16>, vector<16x32xf32> -> vector<16x32xf32>
    %252 = vector.broadcast %133 : vector<1x32xf32> to vector<16x32xf32>
    %253 = arith.addf %251, %252 : vector<16x32xf32>
    %254 = arith.addf %228, %253 : vector<16x32xf32>
    %cst_139 = arith.constant dense<0.000000e+00> : vector<16xf32>
    %255 = vector.multi_reduction <add>, %254, %cst_139 [1] : vector<16x32xf32> to vector<16xf32>
    %256 = vector.shape_cast %255 : vector<16xf32> to vector<16x1xf32>
    %cst_140 = arith.constant 3.200000e+01 : f32
    %257 = vector.broadcast %cst_140 : f32 to vector<16x1xf32>
    %258 = arith.divf %256, %257 : vector<16x1xf32>
    %259 = vector.broadcast %258 : vector<16x1xf32> to vector<16x32xf32>
    %260 = arith.subf %254, %259 : vector<16x32xf32>
    %261 = arith.mulf %260, %260 : vector<16x32xf32>
    %cst_141 = arith.constant dense<0.000000e+00> : vector<16xf32>
    %262 = vector.multi_reduction <add>, %261, %cst_141 [1] : vector<16x32xf32> to vector<16xf32>
    %263 = vector.shape_cast %262 : vector<16xf32> to vector<16x1xf32>
    %cst_142 = arith.constant 3.200000e+01 : f32
    %264 = vector.broadcast %cst_142 : f32 to vector<16x1xf32>
    %265 = arith.divf %263, %264 : vector<16x1xf32>
    %266 = vector.broadcast %258 : vector<16x1xf32> to vector<16x32xf32>
    %267 = arith.subf %254, %266 : vector<16x32xf32>
    %cst_143 = arith.constant 9.99999996E-13 : f32
    %268 = vector.broadcast %cst_143 : f32 to vector<16x1xf32>
    %269 = arith.addf %265, %268 : vector<16x1xf32>
    %270 = math.rsqrt %269 : vector<16x1xf32>
    %271 = vector.broadcast %270 : vector<16x1xf32> to vector<16x32xf32>
    %272 = arith.mulf %267, %271 : vector<16x32xf32>
    %273 = vector.broadcast %134 : vector<1x32xf32> to vector<16x32xf32>
    %274 = arith.mulf %272, %273 : vector<16x32xf32>
    %275 = vector.broadcast %135 : vector<1x32xf32> to vector<16x32xf32>
    %276 = arith.addf %274, %275 : vector<16x32xf32>
    %c1_144 = arith.constant 1 : index
    %c0_145 = arith.constant 0 : index
    %c0_146 = arith.constant 0 : index
    %277 = vector.load %arg10[%c1_144, %c0_145, %c0_146] : memref<2x8x128xf32, #tpu.memory_space<vmem>>, vector<1x8x128xf32>
    %278 = vector.shape_cast %277 : vector<1x8x128xf32> to vector<8x128xf32>
    %279 = vector.extract_strided_slice %278 {offsets = [0, 0], sizes = [1, 96], strides = [1, 1]} : vector<8x128xf32> to vector<1x96xf32>
    %280 = vector.extract_strided_slice %278 {offsets = [1, 0], sizes = [1, 32], strides = [1, 1]} : vector<8x128xf32> to vector<1x32xf32>
    %281 = vector.extract_strided_slice %278 {offsets = [2, 0], sizes = [1, 32], strides = [1, 1]} : vector<8x128xf32> to vector<1x32xf32>
    %282 = vector.extract_strided_slice %278 {offsets = [3, 0], sizes = [1, 32], strides = [1, 1]} : vector<8x128xf32> to vector<1x32xf32>
    %283 = vector.extract_strided_slice %278 {offsets = [4, 0], sizes = [1, 64], strides = [1, 1]} : vector<8x128xf32> to vector<1x64xf32>
    %284 = vector.extract_strided_slice %278 {offsets = [5, 0], sizes = [1, 32], strides = [1, 1]} : vector<8x128xf32> to vector<1x32xf32>
    %285 = vector.extract_strided_slice %278 {offsets = [6, 0], sizes = [1, 32], strides = [1, 1]} : vector<8x128xf32> to vector<1x32xf32>
    %286 = vector.extract_strided_slice %278 {offsets = [7, 0], sizes = [1, 32], strides = [1, 1]} : vector<8x128xf32> to vector<1x32xf32>
    %287 = arith.truncf %276 : vector<16x32xf32> to vector<16x32xbf16>
    %c1_147 = arith.constant 1 : index
    %c0_148 = arith.constant 0 : index
    %c0_149 = arith.constant 0 : index
    %288 = vector.load %arg6[%c1_147, %c0_148, %c0_149] : memref<2x32x96xbf16, #tpu.memory_space<vmem>>, vector<1x32x96xbf16>
    %289 = vector.shape_cast %288 : vector<1x32x96xbf16> to vector<32x96xbf16>
    %cst_150 = arith.constant dense<0.000000e+00> : vector<16x96xf32>
    %290 = tpu.matmul %287, %289, %cst_150 {dimension_numbers = #tpu.dot_dimension_numbers<[1], [0], [0], [1], [0, 0, 1, 1], [], []>} : vector<16x32xbf16>, vector<32x96xbf16>, vector<16x96xf32> -> vector<16x96xf32>
    %291 = vector.broadcast %279 : vector<1x96xf32> to vector<16x96xf32>
    %292 = arith.addf %290, %291 : vector<16x96xf32>
    %293 = vector.extract_strided_slice %292 {offsets = [0, 0], sizes = [16, 32], strides = [1, 1]} : vector<16x96xf32> to vector<16x32xf32>
    %cst_151 = arith.constant 0.353553385 : f32
    %294 = vector.broadcast %cst_151 : f32 to vector<16x32xf32>
    %295 = arith.mulf %293, %294 : vector<16x32xf32>
    %296 = vector.extract_strided_slice %292 {offsets = [0, 32], sizes = [16, 32], strides = [1, 1]} : vector<16x96xf32> to vector<16x32xf32>
    %297 = vector.extract_strided_slice %292 {offsets = [0, 64], sizes = [16, 32], strides = [1, 1]} : vector<16x96xf32> to vector<16x32xf32>
    %298 = vector.extract_strided_slice %295 {offsets = [0, 0], sizes = [16, 8], strides = [1, 1]} : vector<16x32xf32> to vector<16x8xf32>
    %299 = vector.extract_strided_slice %296 {offsets = [0, 0], sizes = [16, 8], strides = [1, 1]} : vector<16x32xf32> to vector<16x8xf32>
    %cst_152 = arith.constant dense<0.000000e+00> : vector<16x16xf32>
    %300 = tpu.matmul %298, %299, %cst_152 {dimension_numbers = #tpu.dot_dimension_numbers<[1], [1], [0], [0], [0, 0, 1, 0], [], []>} : vector<16x8xf32>, vector<16x8xf32>, vector<16x16xf32> -> vector<16x16xf32>
    %301 = arith.addf %300, %125 : vector<16x16xf32>
    %302 = math.exp %301 : vector<16x16xf32>
    %cst_153 = arith.constant dense<0.000000e+00> : vector<16xf32>
    %303 = vector.multi_reduction <add>, %302, %cst_153 [1] : vector<16x16xf32> to vector<16xf32>
    %304 = vector.shape_cast %303 : vector<16xf32> to vector<16x1xf32>
    %305 = tpu.reciprocal %304 {approx = true} : vector<16x1xf32> -> vector<16x1xf32>
    %306 = vector.broadcast %305 : vector<16x1xf32> to vector<16x16xf32>
    %307 = arith.mulf %302, %306 : vector<16x16xf32>
    %308 = vector.extract_strided_slice %297 {offsets = [0, 0], sizes = [16, 8], strides = [1, 1]} : vector<16x32xf32> to vector<16x8xf32>
    %cst_154 = arith.constant dense<0.000000e+00> : vector<16x8xf32>
    %309 = tpu.matmul %307, %308, %cst_154 {dimension_numbers = #tpu.dot_dimension_numbers<[1], [0], [0], [1], [0, 0, 1, 1], [], []>} : vector<16x16xf32>, vector<16x8xf32>, vector<16x8xf32> -> vector<16x8xf32>
    %c0_155 = arith.constant 0 : index
    %c0_156 = arith.constant 0 : index
    %310 = vector.load %arg16[%c0_155, %c0_156] : memref<16x32xf32, #tpu.memory_space<vmem>>, vector<16x8xf32>
    tpu.vector_store %arg16[%c0_155, %c0_156], %309 {strides = array<i32>} : memref<16x32xf32, #tpu.memory_space<vmem>>, vector<16x8xf32>,
    %311 = vector.extract_strided_slice %295 {offsets = [0, 8], sizes = [16, 8], strides = [1, 1]} : vector<16x32xf32> to vector<16x8xf32>
    %312 = vector.extract_strided_slice %296 {offsets = [0, 8], sizes = [16, 8], strides = [1, 1]} : vector<16x32xf32> to vector<16x8xf32>
    %cst_157 = arith.constant dense<0.000000e+00> : vector<16x16xf32>
    %313 = tpu.matmul %311, %312, %cst_157 {dimension_numbers = #tpu.dot_dimension_numbers<[1], [1], [0], [0], [0, 0, 1, 0], [], []>} : vector<16x8xf32>, vector<16x8xf32>, vector<16x16xf32> -> vector<16x16xf32>
    %314 = arith.addf %313, %125 : vector<16x16xf32>
    %315 = math.exp %314 : vector<16x16xf32>
    %cst_158 = arith.constant dense<0.000000e+00> : vector<16xf32>
    %316 = vector.multi_reduction <add>, %315, %cst_158 [1] : vector<16x16xf32> to vector<16xf32>
    %317 = vector.shape_cast %316 : vector<16xf32> to vector<16x1xf32>
    %318 = tpu.reciprocal %317 {approx = true} : vector<16x1xf32> -> vector<16x1xf32>
    %319 = vector.broadcast %318 : vector<16x1xf32> to vector<16x16xf32>
    %320 = arith.mulf %315, %319 : vector<16x16xf32>
    %321 = vector.extract_strided_slice %297 {offsets = [0, 8], sizes = [16, 8], strides = [1, 1]} : vector<16x32xf32> to vector<16x8xf32>
    %cst_159 = arith.constant dense<0.000000e+00> : vector<16x8xf32>
    %322 = tpu.matmul %320, %321, %cst_159 {dimension_numbers = #tpu.dot_dimension_numbers<[1], [0], [0], [1], [0, 0, 1, 1], [], []>} : vector<16x16xf32>, vector<16x8xf32>, vector<16x8xf32> -> vector<16x8xf32>
    %c0_160 = arith.constant 0 : index
    %c8_161 = arith.constant 8 : index
    %323 = vector.load %arg16[%c0_160, %c8_161] : memref<16x32xf32, #tpu.memory_space<vmem>>, vector<16x8xf32>
    tpu.vector_store %arg16[%c0_160, %c8_161], %322 {strides = array<i32>} : memref<16x32xf32, #tpu.memory_space<vmem>>, vector<16x8xf32>,
    %324 = vector.extract_strided_slice %295 {offsets = [0, 16], sizes = [16, 8], strides = [1, 1]} : vector<16x32xf32> to vector<16x8xf32>
    %325 = vector.extract_strided_slice %296 {offsets = [0, 16], sizes = [16, 8], strides = [1, 1]} : vector<16x32xf32> to vector<16x8xf32>
    %cst_162 = arith.constant dense<0.000000e+00> : vector<16x16xf32>
    %326 = tpu.matmul %324, %325, %cst_162 {dimension_numbers = #tpu.dot_dimension_numbers<[1], [1], [0], [0], [0, 0, 1, 0], [], []>} : vector<16x8xf32>, vector<16x8xf32>, vector<16x16xf32> -> vector<16x16xf32>
    %327 = arith.addf %326, %125 : vector<16x16xf32>
    %328 = math.exp %327 : vector<16x16xf32>
    %cst_163 = arith.constant dense<0.000000e+00> : vector<16xf32>
    %329 = vector.multi_reduction <add>, %328, %cst_163 [1] : vector<16x16xf32> to vector<16xf32>
    %330 = vector.shape_cast %329 : vector<16xf32> to vector<16x1xf32>
    %331 = tpu.reciprocal %330 {approx = true} : vector<16x1xf32> -> vector<16x1xf32>
    %332 = vector.broadcast %331 : vector<16x1xf32> to vector<16x16xf32>
    %333 = arith.mulf %328, %332 : vector<16x16xf32>
    %334 = vector.extract_strided_slice %297 {offsets = [0, 16], sizes = [16, 8], strides = [1, 1]} : vector<16x32xf32> to vector<16x8xf32>
    %cst_164 = arith.constant dense<0.000000e+00> : vector<16x8xf32>
    %335 = tpu.matmul %333, %334, %cst_164 {dimension_numbers = #tpu.dot_dimension_numbers<[1], [0], [0], [1], [0, 0, 1, 1], [], []>} : vector<16x16xf32>, vector<16x8xf32>, vector<16x8xf32> -> vector<16x8xf32>
    %c0_165 = arith.constant 0 : index
    %c16_166 = arith.constant 16 : index
    %336 = vector.load %arg16[%c0_165, %c16_166] : memref<16x32xf32, #tpu.memory_space<vmem>>, vector<16x8xf32>
    tpu.vector_store %arg16[%c0_165, %c16_166], %335 {strides = array<i32>} : memref<16x32xf32, #tpu.memory_space<vmem>>, vector<16x8xf32>,
    %337 = vector.extract_strided_slice %295 {offsets = [0, 24], sizes = [16, 8], strides = [1, 1]} : vector<16x32xf32> to vector<16x8xf32>
    %338 = vector.extract_strided_slice %296 {offsets = [0, 24], sizes = [16, 8], strides = [1, 1]} : vector<16x32xf32> to vector<16x8xf32>
    %cst_167 = arith.constant dense<0.000000e+00> : vector<16x16xf32>
    %339 = tpu.matmul %337, %338, %cst_167 {dimension_numbers = #tpu.dot_dimension_numbers<[1], [1], [0], [0], [0, 0, 1, 0], [], []>} : vector<16x8xf32>, vector<16x8xf32>, vector<16x16xf32> -> vector<16x16xf32>
    %340 = arith.addf %339, %125 : vector<16x16xf32>
    %341 = math.exp %340 : vector<16x16xf32>
    %cst_168 = arith.constant dense<0.000000e+00> : vector<16xf32>
    %342 = vector.multi_reduction <add>, %341, %cst_168 [1] : vector<16x16xf32> to vector<16xf32>
    %343 = vector.shape_cast %342 : vector<16xf32> to vector<16x1xf32>
    %344 = tpu.reciprocal %343 {approx = true} : vector<16x1xf32> -> vector<16x1xf32>
    %345 = vector.broadcast %344 : vector<16x1xf32> to vector<16x16xf32>
    %346 = arith.mulf %341, %345 : vector<16x16xf32>
    %347 = vector.extract_strided_slice %297 {offsets = [0, 24], sizes = [16, 8], strides = [1, 1]} : vector<16x32xf32> to vector<16x8xf32>
    %cst_169 = arith.constant dense<0.000000e+00> : vector<16x8xf32>
    %348 = tpu.matmul %346, %347, %cst_169 {dimension_numbers = #tpu.dot_dimension_numbers<[1], [0], [0], [1], [0, 0, 1, 1], [], []>} : vector<16x16xf32>, vector<16x8xf32>, vector<16x8xf32> -> vector<16x8xf32>
    %c0_170 = arith.constant 0 : index
    %c24_171 = arith.constant 24 : index
    %349 = vector.load %arg16[%c0_170, %c24_171] : memref<16x32xf32, #tpu.memory_space<vmem>>, vector<16x8xf32>
    tpu.vector_store %arg16[%c0_170, %c24_171], %348 {strides = array<i32>} : memref<16x32xf32, #tpu.memory_space<vmem>>, vector<16x8xf32>,
    %c0_172 = arith.constant 0 : index
    %c0_173 = arith.constant 0 : index
    %350 = vector.load %arg16[%c0_172, %c0_173] : memref<16x32xf32, #tpu.memory_space<vmem>>, vector<16x32xf32>
    %351 = arith.truncf %350 : vector<16x32xf32> to vector<16x32xbf16>
    %c1_174 = arith.constant 1 : index
    %c0_175 = arith.constant 0 : index
    %c0_176 = arith.constant 0 : index
    %352 = vector.load %arg7[%c1_174, %c0_175, %c0_176] : memref<2x32x32xbf16, #tpu.memory_space<vmem>>, vector<1x32x32xbf16>
    %353 = vector.shape_cast %352 : vector<1x32x32xbf16> to vector<32x32xbf16>
    %cst_177 = arith.constant dense<0.000000e+00> : vector<16x32xf32>
    %354 = tpu.matmul %351, %353, %cst_177 {dimension_numbers = #tpu.dot_dimension_numbers<[1], [0], [0], [1], [0, 0, 1, 1], [], []>} : vector<16x32xbf16>, vector<32x32xbf16>, vector<16x32xf32> -> vector<16x32xf32>
    %355 = vector.broadcast %280 : vector<1x32xf32> to vector<16x32xf32>
    %356 = arith.addf %354, %355 : vector<16x32xf32>
    %357 = arith.addf %276, %356 : vector<16x32xf32>
    %cst_178 = arith.constant dense<0.000000e+00> : vector<16xf32>
    %358 = vector.multi_reduction <add>, %357, %cst_178 [1] : vector<16x32xf32> to vector<16xf32>
    %359 = vector.shape_cast %358 : vector<16xf32> to vector<16x1xf32>
    %cst_179 = arith.constant 3.200000e+01 : f32
    %360 = vector.broadcast %cst_179 : f32 to vector<16x1xf32>
    %361 = arith.divf %359, %360 : vector<16x1xf32>
    %362 = vector.broadcast %361 : vector<16x1xf32> to vector<16x32xf32>
    %363 = arith.subf %357, %362 : vector<16x32xf32>
    %364 = arith.mulf %363, %363 : vector<16x32xf32>
    %cst_180 = arith.constant dense<0.000000e+00> : vector<16xf32>
    %365 = vector.multi_reduction <add>, %364, %cst_180 [1] : vector<16x32xf32> to vector<16xf32>
    %366 = vector.shape_cast %365 : vector<16xf32> to vector<16x1xf32>
    %cst_181 = arith.constant 3.200000e+01 : f32
    %367 = vector.broadcast %cst_181 : f32 to vector<16x1xf32>
    %368 = arith.divf %366, %367 : vector<16x1xf32>
    %369 = vector.broadcast %361 : vector<16x1xf32> to vector<16x32xf32>
    %370 = arith.subf %357, %369 : vector<16x32xf32>
    %cst_182 = arith.constant 9.99999996E-13 : f32
    %371 = vector.broadcast %cst_182 : f32 to vector<16x1xf32>
    %372 = arith.addf %368, %371 : vector<16x1xf32>
    %373 = math.rsqrt %372 : vector<16x1xf32>
    %374 = vector.broadcast %373 : vector<16x1xf32> to vector<16x32xf32>
    %375 = arith.mulf %370, %374 : vector<16x32xf32>
    %376 = vector.broadcast %281 : vector<1x32xf32> to vector<16x32xf32>
    %377 = arith.mulf %375, %376 : vector<16x32xf32>
    %378 = vector.broadcast %282 : vector<1x32xf32> to vector<16x32xf32>
    %379 = arith.addf %377, %378 : vector<16x32xf32>
    %380 = arith.truncf %379 : vector<16x32xf32> to vector<16x32xbf16>
    %c1_183 = arith.constant 1 : index
    %c0_184 = arith.constant 0 : index
    %c0_185 = arith.constant 0 : index
    %381 = vector.load %arg8[%c1_183, %c0_184, %c0_185] : memref<2x32x64xbf16, #tpu.memory_space<vmem>>, vector<1x32x64xbf16>
    %382 = vector.shape_cast %381 : vector<1x32x64xbf16> to vector<32x64xbf16>
    %cst_186 = arith.constant dense<0.000000e+00> : vector<16x64xf32>
    %383 = tpu.matmul %380, %382, %cst_186 {dimension_numbers = #tpu.dot_dimension_numbers<[1], [0], [0], [1], [0, 0, 1, 1], [], []>} : vector<16x32xbf16>, vector<32x64xbf16>, vector<16x64xf32> -> vector<16x64xf32>
    %384 = vector.broadcast %283 : vector<1x64xf32> to vector<16x64xf32>
    %385 = arith.addf %383, %384 : vector<16x64xf32>
    %cst_187 = arith.constant 5.000000e-01 : f32
    %386 = vector.broadcast %cst_187 : f32 to vector<16x64xf32>
    %387 = arith.mulf %386, %385 : vector<16x64xf32>
    %cst_188 = arith.constant 4.471500e-02 : f32
    %388 = vector.broadcast %cst_188 : f32 to vector<16x64xf32>
    %389 = arith.mulf %388, %385 : vector<16x64xf32>
    %390 = arith.mulf %389, %385 : vector<16x64xf32>
    %391 = arith.mulf %390, %385 : vector<16x64xf32>
    %392 = arith.addf %385, %391 : vector<16x64xf32>
    %cst_189 = arith.constant 0.797884583 : f32
    %393 = vector.broadcast %cst_189 : f32 to vector<16x64xf32>
    %394 = arith.mulf %393, %392 : vector<16x64xf32>
    %395 = math.tanh %394 : vector<16x64xf32>
    %cst_190 = arith.constant 1.000000e+00 : f32
    %396 = vector.broadcast %cst_190 : f32 to vector<16x64xf32>
    %397 = arith.addf %396, %395 : vector<16x64xf32>
    %398 = arith.mulf %387, %397 : vector<16x64xf32>
    %399 = arith.truncf %398 : vector<16x64xf32> to vector<16x64xbf16>
    %c1_191 = arith.constant 1 : index
    %c0_192 = arith.constant 0 : index
    %c0_193 = arith.constant 0 : index
    %400 = vector.load %arg9[%c1_191, %c0_192, %c0_193] : memref<2x64x32xbf16, #tpu.memory_space<vmem>>, vector<1x64x32xbf16>
    %401 = vector.shape_cast %400 : vector<1x64x32xbf16> to vector<64x32xbf16>
    %cst_194 = arith.constant dense<0.000000e+00> : vector<16x32xf32>
    %402 = tpu.matmul %399, %401, %cst_194 {dimension_numbers = #tpu.dot_dimension_numbers<[1], [0], [0], [1], [0, 0, 1, 1], [], []>} : vector<16x64xbf16>, vector<64x32xbf16>, vector<16x32xf32> -> vector<16x32xf32>
    %403 = vector.broadcast %284 : vector<1x32xf32> to vector<16x32xf32>
    %404 = arith.addf %402, %403 : vector<16x32xf32>
    %405 = arith.addf %379, %404 : vector<16x32xf32>
    %cst_195 = arith.constant dense<0.000000e+00> : vector<16xf32>
    %406 = vector.multi_reduction <add>, %405, %cst_195 [1] : vector<16x32xf32> to vector<16xf32>
    %407 = vector.shape_cast %406 : vector<16xf32> to vector<16x1xf32>
    %cst_196 = arith.constant 3.200000e+01 : f32
    %408 = vector.broadcast %cst_196 : f32 to vector<16x1xf32>
    %409 = arith.divf %407, %408 : vector<16x1xf32>
    %410 = vector.broadcast %409 : vector<16x1xf32> to vector<16x32xf32>
    %411 = arith.subf %405, %410 : vector<16x32xf32>
    %412 = arith.mulf %411, %411 : vector<16x32xf32>
    %cst_197 = arith.constant dense<0.000000e+00> : vector<16xf32>
    %413 = vector.multi_reduction <add>, %412, %cst_197 [1] : vector<16x32xf32> to vector<16xf32>
    %414 = vector.shape_cast %413 : vector<16xf32> to vector<16x1xf32>
    %cst_198 = arith.constant 3.200000e+01 : f32
    %415 = vector.broadcast %cst_198 : f32 to vector<16x1xf32>
    %416 = arith.divf %414, %415 : vector<16x1xf32>
    %417 = vector.broadcast %409 : vector<16x1xf32> to vector<16x32xf32>
    %418 = arith.subf %405, %417 : vector<16x32xf32>
    %cst_199 = arith.constant 9.99999996E-13 : f32
    %419 = vector.broadcast %cst_199 : f32 to vector<16x1xf32>
    %420 = arith.addf %416, %419 : vector<16x1xf32>
    %421 = math.rsqrt %420 : vector<16x1xf32>
    %422 = vector.broadcast %421 : vector<16x1xf32> to vector<16x32xf32>
    %423 = arith.mulf %418, %422 : vector<16x32xf32>
    %424 = vector.broadcast %285 : vector<1x32xf32> to vector<16x32xf32>
    %425 = arith.mulf %423, %424 : vector<16x32xf32>
    %426 = vector.broadcast %286 : vector<1x32xf32> to vector<16x32xf32>
    %427 = arith.addf %425, %426 : vector<16x32xf32>
    %428 = arith.truncf %427 : vector<16x32xf32> to vector<16x32xbf16>
    %c0_200 = arith.constant 0 : index
    %c0_201 = arith.constant 0 : index
    %429 = vector.load %arg11[%c0_200, %c0_201] : memref<32x32xbf16, #tpu.memory_space<vmem>>, vector<32x32xbf16>
    %cst_202 = arith.constant dense<0.000000e+00> : vector<16x32xf32>
    %430 = tpu.matmul %428, %429, %cst_202 {dimension_numbers = #tpu.dot_dimension_numbers<[1], [0], [0], [1], [0, 0, 1, 1], [], []>} : vector<16x32xbf16>, vector<32x32xbf16>, vector<16x32xf32> -> vector<16x32xf32>
    %431 = vector.broadcast %3 : vector<1x32xf32> to vector<16x32xf32>
    %432 = arith.addf %430, %431 : vector<16x32xf32>
    %433 = math.tanh %432 : vector<16x32xf32>
    %434 = arith.truncf %433 : vector<16x32xf32> to vector<16x32xbf16>
    %c0_203 = arith.constant 0 : index
    %c0_204 = arith.constant 0 : index
    %435 = vector.load %arg12[%c0_203, %c0_204] : memref<32x32xbf16, #tpu.memory_space<vmem>>, vector<32x32xbf16>
    %cst_205 = arith.constant dense<0.000000e+00> : vector<16x32xf32>
    %436 = tpu.matmul %434, %435, %cst_205 {dimension_numbers = #tpu.dot_dimension_numbers<[1], [0], [0], [1], [0, 0, 1, 1], [], []>} : vector<16x32xbf16>, vector<32x32xbf16>, vector<16x32xf32> -> vector<16x32xf32>
    %437 = vector.broadcast %4 : vector<1x32xf32> to vector<16x32xf32>
    %438 = arith.addf %436, %437 : vector<16x32xf32>
    %cst_206 = arith.constant 0.000000e+00 : f32
    %439 = vector.broadcast %cst_206 : f32 to vector<16x32xf32>
    %440 = arith.maximumf %438, %439 : vector<16x32xf32>
    %441 = arith.truncf %440 : vector<16x32xf32> to vector<16x32xbf16>
    %c0_207 = arith.constant 0 : index
    %c0_208 = arith.constant 0 : index
    %442 = vector.load %arg13[%c0_207, %c0_208] : memref<32x128xbf16, #tpu.memory_space<vmem>>, vector<32x128xbf16>
    %cst_209 = arith.constant dense<0.000000e+00> : vector<16x128xf32>
    %443 = tpu.matmul %441, %442, %cst_209 {dimension_numbers = #tpu.dot_dimension_numbers<[1], [0], [0], [1], [0, 0, 1, 1], [], []>} : vector<16x32xbf16>, vector<32x128xbf16>, vector<16x128xf32> -> vector<16x128xf32>
    %444 = vector.broadcast %5 : vector<1x128xf32> to vector<16x128xf32>
    %445 = arith.addf %443, %444 : vector<16x128xf32>
    %c0_210 = arith.constant 0 : index
    %c0_211 = arith.constant 0 : index
    %446 = vector.load %arg14[%c0_210, %c0_211] : memref<16x128xf32, #tpu.memory_space<vmem>>, vector<16x128xf32>
    tpu.vector_store %arg14[%c0_210, %c0_211], %445 {strides = array<i32>} : memref<16x128xf32, #tpu.memory_space<vmem>>, vector<16x128xf32>,
    return
  }
  func.func @transform_0(%arg0: i32, %arg1: memref<16xi32, #tpu.memory_space<smem>>) -> (i32, i32) {
    %c0_i32 = arith.constant 0 : i32
    %c0_i32_0 = arith.constant 0 : i32
    %c0_i32_1 = arith.constant 0 : i32
    return %c0_i32, %c0_i32_0 : i32, i32
  }
  func.func @transform_1(%arg0: i32, %arg1: memref<16xi32, #tpu.memory_space<smem>>) -> (i32, i32) {
    %c0_i32 = arith.constant 0 : i32
    %c0_i32_0 = arith.constant 0 : i32
    %c0_i32_1 = arith.constant 0 : i32
    return %c0_i32, %c0_i32_0 : i32, i32
  }
  func.func @transform_2(%arg0: i32, %arg1: memref<16xi32, #tpu.memory_space<smem>>) -> (i32, i32) {
    %c0_i32 = arith.constant 0 : i32
    %c0_i32_0 = arith.constant 0 : i32
    %c0_i32_1 = arith.constant 0 : i32
    return %c0_i32, %c0_i32_0 : i32, i32
  }
  func.func @transform_3(%arg0: i32, %arg1: memref<16xi32, #tpu.memory_space<smem>>) -> (i32, i32) {
    %c0_i32 = arith.constant 0 : i32
    %c0_i32_0 = arith.constant 0 : i32
    %c0_i32_1 = arith.constant 0 : i32
    return %c0_i32, %c0_i32_0 : i32, i32
  }
  func.func @transform_4(%arg0: i32, %arg1: memref<16xi32, #tpu.memory_space<smem>>) -> (i32, i32, i32) {
    %c0_i32 = arith.constant 0 : i32
    %c0_i32_0 = arith.constant 0 : i32
    %c0_i32_1 = arith.constant 0 : i32
    %c0_i32_2 = arith.constant 0 : i32
    return %c0_i32, %c0_i32_0, %c0_i32_1 : i32, i32, i32
  }
  func.func @transform_5(%arg0: i32, %arg1: memref<16xi32, #tpu.memory_space<smem>>) -> (i32, i32, i32) {
    %c0_i32 = arith.constant 0 : i32
    %c0_i32_0 = arith.constant 0 : i32
    %c0_i32_1 = arith.constant 0 : i32
    %c0_i32_2 = arith.constant 0 : i32
    return %c0_i32, %c0_i32_0, %c0_i32_1 : i32, i32, i32
  }
  func.func @transform_6(%arg0: i32, %arg1: memref<16xi32, #tpu.memory_space<smem>>) -> (i32, i32, i32) {
    %c0_i32 = arith.constant 0 : i32
    %c0_i32_0 = arith.constant 0 : i32
    %c0_i32_1 = arith.constant 0 : i32
    %c0_i32_2 = arith.constant 0 : i32
    return %c0_i32, %c0_i32_0, %c0_i32_1 : i32, i32, i32
  }
  func.func @transform_7(%arg0: i32, %arg1: memref<16xi32, #tpu.memory_space<smem>>) -> (i32, i32, i32) {
    %c0_i32 = arith.constant 0 : i32
    %c0_i32_0 = arith.constant 0 : i32
    %c0_i32_1 = arith.constant 0 : i32
    %c0_i32_2 = arith.constant 0 : i32
    return %c0_i32, %c0_i32_0, %c0_i32_1 : i32, i32, i32
  }
  func.func @transform_8(%arg0: i32, %arg1: memref<16xi32, #tpu.memory_space<smem>>) -> (i32, i32, i32) {
    %c0_i32 = arith.constant 0 : i32
    %c0_i32_0 = arith.constant 0 : i32
    %c0_i32_1 = arith.constant 0 : i32
    %c0_i32_2 = arith.constant 0 : i32
    return %c0_i32, %c0_i32_0, %c0_i32_1 : i32, i32, i32
  }
  func.func @transform_9(%arg0: i32, %arg1: memref<16xi32, #tpu.memory_space<smem>>) -> (i32, i32) {
    %c0_i32 = arith.constant 0 : i32
    %c0_i32_0 = arith.constant 0 : i32
    %c0_i32_1 = arith.constant 0 : i32
    return %c0_i32, %c0_i32_0 : i32, i32
  }
  func.func @transform_10(%arg0: i32, %arg1: memref<16xi32, #tpu.memory_space<smem>>) -> (i32, i32) {
    %c0_i32 = arith.constant 0 : i32
    %c0_i32_0 = arith.constant 0 : i32
    %c0_i32_1 = arith.constant 0 : i32
    return %c0_i32, %c0_i32_0 : i32, i32
  }
  func.func @transform_11(%arg0: i32, %arg1: memref<16xi32, #tpu.memory_space<smem>>) -> (i32, i32) {
    %c0_i32 = arith.constant 0 : i32
    %c0_i32_0 = arith.constant 0 : i32
    %c0_i32_1 = arith.constant 0 : i32
    return %c0_i32, %c0_i32_0 : i32, i32
  }
  func.func @transform_12(%arg0: i32, %arg1: memref<16xi32, #tpu.memory_space<smem>>) -> (i32, i32) {
    %c0_i32 = arith.constant 0 : i32
    %c0_i32_0 = arith.constant 0 : i32
    %c0_i32_1 = arith.constant 0 : i32
    return %c0_i32, %c0_i32_0 : i32, i32
  }
}

</mosaic_0001>

<bundles_post_ra>
// kernel: bert_sentiment_forward.1
= control target key start
LH: loop header
LB: loop body
LE: loop exit
PB: predicated region body
PF: predicated region fallthrough
CT: control target
= control target key end

     0   :  { %s4225_s0 = inlined_call_operand.vmem [shape: s32[16], index: 0, kind: input, shape index: {}]   ;;  %s4226_s1 = inlined_call_operand.vmem [shape: f32[100,32], index: 1, kind: input, shape index: {}]   ;;  %s4227_s2 = inlined_call_operand.vmem [shape: f32[8,32], index: 2, kind: input, shape index: {}]   ;;  %s4228_s3 = inlined_call_operand.vmem [shape: f32[16,16], index: 3, kind: input, shape index: {}]   ;;  %s4229_s4 = inlined_call_operand.vmem [shape: f32[8,128], index: 4, kind: input, shape index: {}]   ;;  %s4230_s5 = inlined_call_operand.vmem [shape: bf16[2,32,96], index: 5, kind: input, shape index: {}]   ;;  %s4231_s6 = inlined_call_operand.vmem [shape: bf16[2,32,32], index: 6, kind: input, shape index: {}]   ;;  %s4232_s7 = inlined_call_operand.vmem [shape: bf16[2,32,64], index: 7, kind: input, shape index: {}]   ;;  %s4233_s8 = inlined_call_operand.vmem [shape: bf16[2,64,32], index: 8, kind: input, shape index: {}]   ;;  %s4234_s9 = inlined_call_operand.vmem [shape: f32[2,8,128], index: 9, kind: input, shape index: {}]   ;;  %s4235_s10 = inlined_call_operand.vmem [shape: bf16[32,32], index: 10, kind: input, shape index: {}]   ;;  %s4236_s11 = inlined_call_operand.vmem [shape: bf16[32,32], index: 11, kind: input, shape index: {}]   ;;  %s4237_s12 = inlined_call_operand.vmem [shape: bf16[32,128], index: 12, kind: input, shape index: {}]   ;;  %s4238_s13 = inlined_call_operand.vmem [shape: f32[16,128], index: 13, kind: output, shape index: {}]  }
   0x1   :  { %4242 = sst [smem:[#allocation7_spill]] %s4236_s11  ;;  %s18_s27 = sshll.u32 %s4225_s0, 4  ;;  %s19_s27 = int_to_ptr.vmem [resolvable:$true] %s18_s27 }
   0x2   :  { %4243 = sst [smem:[#allocation8_spill]] %s4237_s12  ;;  %s3511_s28 = scalar_lea.vmem %s19_s27, 16 }
   0x3   :  { %4244 = sst [smem:[#allocation9_spill]] %s4238_s13  ;;  %p3512_p0 = scmp.ne.s32.totalorder %s19_s27, %s3511_s28 }
   0x4   :  { %p3516_p1 = scmp.lt.s32.totalorder %s19_s27, %s19_s27  ;;  %p3517_p2 = scmp.lt.s32.totalorder %s3511_s28, %s3511_s28 }
   0x6   :  { %p3518_p3 = por %p3517_p2, %p3516_p1 }
   0x8   :  { %p3519_p4 = pnand %p3518_p3, %p3512_p0 }
   0xa   :  { %3522 = shalt.err (!%p3519_p4)  }
   0xb   :  { %s3525_s29 = smov [#allocation5]  }
   0xc   :  { %21 = dma.vmem_to_smem %s19_s27, 16, %s3525_s29, [#allocation4] }
   0xd   :  { %3523 = dma.done.wait [#allocation4], 16 }
   0xe   :  { %3524 = vsyncadd [#allocation4], 4294967280 }
   0xf   :  { %23 = sfence }
  0x10   :  { %s50_s30 = sld [smem:[#allocation5]]  ;;  %s2781_s14 = sld [smem:[#allocation5 + $0x1]]  ;;  %v53_v0 = vld [vmem:[%s4227_s2] sm:$0x1]  ;;  %vm55_vm0 = vcmask 253952   ;;  %vm149_vm1 = vcmask 261120  }
  0x11   :  { %s2782_s15 = sld [smem:[#allocation5 + $0x2]]  ;;  %s2783_s16 = sld [smem:[#allocation5 + $0x3]]  ;;  %v60_v1 = vld [vmem:[%s4227_s2 + $0x1] sm:$0x1]  ;;  %v66_v2 = vld [vmem:[%s4227_s2 + $0x2] sm:$0x1] }
  0x12   :  { %s3618_s0 = sld [smem:[#allocation5 + $0x4]]  ;;  %s3620_s19 = sld [smem:[#allocation5 + $0x5]]  ;;  %v72_v3 = vld [vmem:[%s4227_s2 + $0x3] sm:$0x1]  ;;  %v78_v4 = vld [vmem:[%s4227_s2 + $0x4] sm:$0x1] }
  0x13   :  { %s3625_s22 = sld [smem:[#allocation5 + $0x6]]  ;;  %s3630_s25 = sld [smem:[#allocation5 + $0x7]]  ;;  %v84_v6 = vld [vmem:[%s4227_s2 + $0x5] sm:$0x1]  ;;  %v90_v7 = vld [vmem:[%s4227_s2 + $0x6] sm:$0x1] }
  0x14   :  { %s3632_s26 = sld [smem:[#allocation5 + $0x8]]  ;;  %s3643_s23 = sld [smem:[#allocation5 + $0x9]]  ;;  %v96_v14 = vld [vmem:[%s4227_s2 + $0x7] sm:$0x1]  ;;  %v102_v15 = vld [vmem:[%s4227_s2] sm:$0x1] }
  0x15   :  { %s3681_s21 = sld [smem:[#allocation5 + $0xb]]  ;;  %v108_v22 = vld [vmem:[%s4227_s2 + $0x1] sm:$0x1]  ;;  %v114_v23 = vld [vmem:[%s4227_s2 + $0x2] sm:$0x1]  ;;  %v3526_v63 = vmov 0.0  }
  0x16   :  { %s51_s29 = scalar_lea.vmem %s4226_s1, %s50_s30  ;;  %s58_s12 = scalar_lea.vmem %s4226_s1, %s2781_s14  ;;  %v120_v30 = vld [vmem:[%s4227_s2 + $0x3] sm:$0x1]  ;;  %v126_v33 = vld [vmem:[%s4227_s2 + $0x4] sm:$0x1]  ;;  %v132_v35 = vld [vmem:[%s4227_s2 + $0x5] sm:$0x1]  ;;  %3003 = vmatprep.subr.bf16.mxu0 %v3526_v63 }
  0x17   :  { %v52_v5 = vld [vmem:[%s51_s29] sm:$0x1]  ;;  %s64_s30 = scalar_lea.vmem %s4226_s1, %s2782_s15  ;;  %s70_s13 = scalar_lea.vmem %s4226_s1, %s2783_s16  ;;  %v138_v36 = vld [vmem:[%s4227_s2 + $0x6] sm:$0x1]  ;;  %v144_v38 = vld [vmem:[%s4227_s2 + $0x7] sm:$0x1] }
  0x18   :  { %v54_v8 = vadd.f32 %v53_v0, %v52_v5  ;;  %v59_v9 = vld [vmem:[%s58_s12] sm:$0x1]  ;;  %s3660_s14 = sld [smem:[#allocation5 + $0xa]]  ;;  %s76_s24 = scalar_lea.vmem %s4226_s1, %s3618_s0  ;;  %v3389_v0 = vld [vmem:[%s4230_s5 + $0x8] sm:$0xff]   ;;  %vm3527_vm2 = vmmov 0   ;;  %v177_v5 = vlaneseq  ;;  %vm265_vm3 = vcmask 64512  }
  0x19   :  { %v65_v10 = vld [vmem:[%s64_s30] sm:$0x1]  ;;  %v61_v11 = vadd.f32 %v60_v1, %v59_v9  ;;  %s82_s12 = scalar_lea.vmem %s4226_s1, %s3620_s19  ;;  %s88_s29 = scalar_lea.vmem %s4226_s1, %s3625_s22  ;;  %3007 = vmatprep.mubr.msk.bf16.mxu0 %vm3527_vm2, %v3526_v63  ;;  %vm3818_vm4 = vmpackc.low %vm265_vm3, %vm265_vm3  ;;  %vm355_vm5 = vcmask 130048   ;;  %vm655_vm6 = vcmask 130112   ;;  %vm858_vm7 = vcmask 195712  }
  0x1a   :  { %v67_v12 = vadd.f32 %v66_v2, %v65_v10  ;;  %v71_v13 = vld [vmem:[%s70_s13] sm:$0x1]  ;;  %56 = vst.msk [vmem:[#allocation2] sm:$0x1] %vm55_vm0, %v54_v8  ;;  %s94_s11 = scalar_lea.vmem %s4226_s1, %s3630_s25  ;;  %s100_s27 = scalar_lea.vmem %s4226_s1, %s3632_s26  ;;  %v3765_v8 = vshrl.u32 %v177_v5, 7  ;;  %vm1061_vm8 = vcmask 261312  }
  0x1b   :  { %v73_v16 = vadd.f32 %v72_v3, %v71_v13  ;;  %v77_v17 = vld [vmem:[%s76_s24] sm:$0x1]  ;;  %62 = vst.msk [vmem:[#allocation2 + $0x1] sm:$0x1] %vm55_vm0, %v61_v11  ;;  %s106_s16 = scalar_lea.vmem %s4226_s1, %s3643_s23  ;;  %s2792_s26 = sld [smem:[#allocation5 + $0xc]]  ;;  %vm1291_vm9 = vcmask 523264  }
  0x1c   :  { %v83_v18 = vld [vmem:[%s82_s12] sm:$0x1]  ;;  %68 = vst.msk [vmem:[#allocation2 + $0x2] sm:$0x1] %vm55_vm0, %v67_v12  ;;  %v79_v19 = vadd.f32 %v78_v4, %v77_v17  ;;  %s2793_s0 = sld [smem:[#allocation5 + $0xd]]  ;;  %s118_s22 = scalar_lea.vmem %s4226_s1, %s3681_s21  ;;  %v3768_v9 = vsub.s32 0, %v3765_v8 }
  0x1d   :  { %v85_v20 = vadd.f32 %v84_v6, %v83_v18  ;;  %v89_v21 = vld [vmem:[%s88_s29] sm:$0x1]  ;;  %74 = vst.msk [vmem:[#allocation2 + $0x3] sm:$0x1] %vm55_vm0, %v73_v16  ;;  %s2794_s29 = sld [smem:[#allocation5 + $0xe]]  ;;  %s3528_s25 = smov 88  }
  0x1e   :  { %v91_v24 = vadd.f32 %v90_v7, %v89_v21  ;;  %v95_v25 = vld [vmem:[%s94_s11] sm:$0x1]  ;;  %80 = vst.msk [vmem:[#allocation2 + $0x4] sm:$0x1] %vm55_vm0, %v79_v19  ;;  %s112_s13 = scalar_lea.vmem %s4226_s1, %s3660_s14  ;;  %s2795_s11 = sld [smem:[#allocation5 + $0xf]] }
  0x1f   :  { %v101_v26 = vld [vmem:[%s100_s27] sm:$0x1]  ;;  %86 = vst.msk [vmem:[#allocation2 + $0x5] sm:$0x1] %vm55_vm0, %v85_v20  ;;  %v97_v27 = vadd.f32 %v96_v14, %v95_v25  ;;  %v3775_v14 = vsub.s32 1, %v3765_v8  ;;  %s3529_s17 = smov 96  }
  0x20   :  { %v103_v28 = vadd.f32 %v102_v15, %v101_v26  ;;  %v107_v29 = vld [vmem:[%s106_s16] sm:$0x1]  ;;  %92 = vst.msk [vmem:[#allocation2 + $0x6] sm:$0x1] %vm55_vm0, %v91_v24  ;;  %s3530_s16 = smov 120   ;;  %s3531_s18 = smov 80  }
  0x21   :  { %v109_v31 = vadd.f32 %v108_v22, %v107_v29  ;;  %98 = vst.msk [vmem:[#allocation2 + $0x7] sm:$0x1] %vm55_vm0, %v97_v27  ;;  %v113_v32 = vld [vmem:[%s112_s13] sm:$0x1]  ;;  %s124_s21 = scalar_lea.vmem %s4226_s1, %s2792_s26  ;;  %s3532_s20 = smov 112  }
  0x22   :  { %104 = vst.msk [vmem:[#allocation2 + $0x8] sm:$0x1] %vm55_vm0, %v103_v28  ;;  %v115_v34 = vadd.f32 %v114_v23, %v113_v32  ;;  %v119_v37 = vld [vmem:[%s118_s22] sm:$0x1]  ;;  %s130_s13 = scalar_lea.vmem %s4226_s1, %s2793_s0  ;;  %s3535_s24 = smov 72  }
  0x23   :  { %110 = vst.msk [vmem:[#allocation2 + $0x9] sm:$0x1] %vm55_vm0, %v109_v31  ;;  %v121_v39 = vadd.f32 %v120_v30, %v119_v37  ;;  %v125_v40 = vld [vmem:[%s124_s21] sm:$0x1]  ;;  %s136_s27 = scalar_lea.vmem %s4226_s1, %s2794_s29  ;;  %s3533_s21 = smov 64  }
  0x24   :  { %116 = vst.msk [vmem:[#allocation2 + $0xa] sm:$0x1] %vm55_vm0, %v115_v34  ;;  %v127_v41 = vadd.f32 %v126_v33, %v125_v40  ;;  %v131_v42 = vld [vmem:[%s130_s13] sm:$0x1]  ;;  %s142_s22 = scalar_lea.vmem %s4226_s1, %s2795_s11  ;;  %s3537_s2 = smov 104  }
  0x25   :  { %122 = vst.msk [vmem:[#allocation2 + $0xb] sm:$0x1] %vm55_vm0, %v121_v39  ;;  %v137_v43 = vld [vmem:[%s136_s27] sm:$0x1]  ;;  %v133_v44 = vadd.f32 %v132_v35, %v131_v42  ;;  %s3536_s27 = smov 56   ;;  %s3538_s28 = smov 8  }
  0x26   :  { %v139_v45 = vadd.f32 %v138_v36, %v137_v43  ;;  %v143_v46 = vld [vmem:[%s142_s22] sm:$0x1]  ;;  %128 = vst.msk [vmem:[#allocation2 + $0xc] sm:$0x1] %vm55_vm0, %v127_v41  ;;  %s3539_s22 = smov 40   ;;  %s3540_s1 = smov 16  }
  0x27   :  { %v145_v48 = vadd.f32 %v144_v38, %v143_v46  ;;  %134 = vst.msk [vmem:[#allocation2 + $0xd] sm:$0x1] %vm55_vm0, %v133_v44  ;;  %v3388_v62 = vld [vmem:[%s4230_s5] sm:$0xff]   ;;  %s3541_s12 = smov 24   ;;  %s4247_s30 = sld [smem:[#allocation7_spill]] }
  0x28   :  { %v147_v47 = vld [vmem:[#allocation2] sm:$0xff]  ;;  %140 = vst.msk [vmem:[#allocation2 + $0xe] sm:$0x1] %vm55_vm0, %v139_v45  ;;  %3004 = vmatpush3.bf16.msra.mxu0 %v3388_v62  ;;  %s4248_s26 = sld [smem:[#allocation8_spill]] }
  0x29   :  { %v150_v49 = vsel %vm149_vm1, %v147_v47, 0.0  ;;  %146 = vst.msk [vmem:[#allocation2 + $0xf] sm:$0x1] %vm55_vm0, %v145_v48  ;;  %3005 = vmatprep.subr.bf16.mxu0 %v3526_v63  ;;  %v49_v11 = vld [vmem:[%s4229_s4] sm:$0xff] }
  0x2a   :  { %151 = vadd.xlane.f32.xlu0 %v150_v49  ;;  %v180_v13 = vrot.slane %v49_v11, %v3768_v9  ;;  %v186_v18 = vrot.slane %v49_v11, %v3775_v14  ;;  %v3788_v23 = vld [vmem:[%s4234_s9] sm:$0xff] }
  0x2b   :  { %v200_v24 = vrot.slane %v3788_v23, %v3768_v9 }
  0x2c   :  { %3006 = vmatpush3.bf16.msra.mxu0 %v3389_v0 }
  0x30   :  { %v148_v50 = vld [vmem:[#allocation2 + $0x8] sm:$0xff] }
  0x31   :  { %v153_v51 = vsel %vm149_vm1, %v148_v50, 0.0 }
  0x32   :  { %154 = vadd.xlane.f32.xlu0 %v153_v51 }
  0xb7   :  { %v152_v52 = vpop.xlane.xlu0 %151 }
  0xb8   :  { %v157_v53 = vmul.f32 0.03125, %v152_v52 }
  0xba   :  { %v159_v54 = vsub.f32 %v147_v47, %v157_v53 }
  0xbc   :  { %v161_v55 = vmul.f32 %v159_v54, %v159_v54 }
  0xbe   :  { %v163_v56 = vsel %vm149_vm1, %v161_v55, 0.0  ;;  %v3846_v55 = vld [vmem:[%s4228_s3 + $0x8] sm:$0xff] }
  0xbf   :  { %164 = vadd.xlane.f32.xlu1 %v163_v56  ;;  %v155_v57 = vpop.xlane.xlu0 %154  ;;  %v3851_v56 = vld [vmem:[%s4228_s3] sm:$0xff]  ;;  %s3534_s3 = smov 48  }
  0xc0   :  { %v158_v58 = vmul.f32 0.03125, %v155_v57 }
  0xc2   :  { %v160_v59 = vsub.f32 %v148_v50, %v158_v58 }
  0xc4   :  { %v162_v60 = vmul.f32 %v160_v59, %v160_v59 }
  0xc6   :  { %v166_v61 = vsel %vm149_vm1, %v162_v60, 0.0 }
  0xc7   :  { %167 = vadd.xlane.f32.xlu1 %v166_v61 }
 0x14c   :  { %v165_v1 = vpop.xlane.xlu1 %164 }
 0x14d   :  { %v169_v2 = vmul.f32 0.03125, %v165_v1 }
 0x14f   :  { %v171_v3 = vadd.f32 1e-12, %v169_v2 }
 0x151   :  { %3414 = vrsqrt.f32 %v171_v3 }
 0x154   :  { %v168_v4 = vpop.xlane.xlu1 %167 }
 0x155   :  { %v170_v6 = vmul.f32 0.03125, %v168_v4 }
 0x157   :  { %v172_v7 = vadd.f32 1e-12, %v170_v6 }
 0x159   :  { %3416 = vrsqrt.f32 %v172_v7 }
 0x15b   :  { %v3415_v10 = vpop.eup %3414 }
 0x15c   :  { %v175_v12 = vmul.f32 %v3415_v10, %v159_v54 }
 0x15e   :  { %v181_v17 = vmul.f32 %v180_v13, %v175_v12 }
 0x160   :  { %v3778_v20 = vadd.f32 %v186_v18, %v181_v17 }
 0x163   :  { %v3417_v15 = vpop.eup %3416 }
 0x164   :  { %v176_v16 = vmul.f32 %v3417_v15, %v160_v59 }
 0x166   :  { %v182_v19 = vmul.f32 %v180_v13, %v176_v16 }
 0x168   :  { %v3780_v21 = vadd.f32 %v186_v18, %v182_v19 }
 0x16a   :  { %v192_v22 = vpack.c.bf16 %v3780_v21, %v3778_v20 }
 0x16c   :  { %3008 = vmatmul.mubr.msk.bf16.vlgmr.msra.gmra.mrb[0].mxu0 %vm149_vm1, %v192_v22 }
 0x23f   :  { %v250_v25 = vpop.f32.mrb[0].mxu0 }
 0x240   :  { %v251_v26 = vadd.f32 %v250_v25, %v200_v24  ;;  %v3009_v27 = vpop.f32.mrb[1].mxu0 }
 0x241   :  { %v253_v28 = vpop.f32.mrb[2].mxu0 }
 0x242   :  { %v254_v29 = vadd.f32 %v253_v28, %v200_v24  ;;  %v3010_v30 = vpop.f32.mrb[3].mxu0  ;;  %v3792_v31 = vmul.f32 0.35355338, %v251_v26 }
 0x244   :  { %3015 = vmatprep.mubr.msk.f32.mxu1 %vm265_vm3, %v3792_v31  ;;  %v3796_v32 = vpack.i.bf16 %v254_v29, %v251_v26  ;;  %v3802_v33 = vmul.f32 0.35355338, %v254_v29 }
 0x246   :  { %3314 = vrot.lane.b32.xlu1 %v3796_v32, %s3528_s25  ;;  %3309 = vrot.lane.b32.xlu0 %v3796_v32, %s3529_s17 }
 0x24a   :  { %455 = vrot.lane.b32.xlu1 %v3792_v31, %s3530_s16  ;;  %457 = vrot.lane.b32.xlu0 %v3802_v33, %s3530_s16 }
 0x24e   :  { %3319 = vrot.lane.b32.xlu1 %v3796_v32, %s3531_s18  ;;  %660 = vrot.lane.b32.xlu0 %v3802_v33, %s3532_s20 }
 0x252   :  { %658 = vrot.lane.b32.xlu1 %v3792_v31, %s3532_s20 }
 0x256   :  { %3324 = vrot.lane.b32.xlu1 %v3796_v32, %s3533_s21 }
 0x2b8   :  { %v3315_v34 = vpop.permute.xlu1 %3314  ;;  %v3310_v35 = vpop.permute.xlu0 %3309 }
 0x2b9   :  { %v3317_v36 = vunpack.i.h.bf16 %v3315_v34  ;;  %v3316_v37 = vunpack.i.l.bf16 %v3315_v34  ;;  %v3312_v38 = vunpack.i.h.bf16 %v3310_v35  ;;  %v3311_v39 = vunpack.i.l.bf16 %v3310_v35 }
 0x2bb   :  { %v3221_v41 = vpack.c.bf16 %v3317_v36, %v3316_v37  ;;  %v3211_v42 = vpack.c.bf16 %v3312_v38, %v3311_v39 }
 0x2bc   :  { %v456_v43 = vpop.permute.xlu1 %455  ;;  %v458_v49 = vpop.permute.xlu0 %457 }
 0x2bd   :  { %3213 = vmatprep.subr.msk.bf16.mxu1 %vm3818_vm4, %v3211_v42  ;;  %3223 = vmatprep.subr.msk.bf16.mxu0 %vm3818_vm4, %v3221_v41 }
 0x2be   :  { %3029 = vmatprep.mubr.msk.f32.mxu0 %vm265_vm3, %v456_v43  ;;  %3216 = vmatpush3.bf16.xpose.msk.msra.mxu1 %vm3818_vm4, %v3211_v42 }
 0x2bf   :  { %3226 = vmatpush3.bf16.xpose.msk.msra.mxu0 %vm3818_vm4, %v3221_v41 }
 0x2c0   :  { %v3320_v44 = vpop.permute.xlu1 %3319  ;;  %v661_v54 = vpop.permute.xlu0 %660 }
 0x2c1   :  { %v3322_v45 = vunpack.i.h.bf16 %v3320_v44  ;;  %v3321_v46 = vunpack.i.l.bf16 %v3320_v44 }
 0x2c3   :  { %v3231_v47 = vpack.c.bf16 %v3322_v45, %v3321_v46 }
 0x2c4   :  { %v659_v48 = vpop.permute.xlu1 %658 }
 0x2c5   :  { %3016 = vmatmul.mubr.msk.f32.vlgmr.msra.gmra.mrb[0].mxu1 %vm265_vm3, %v3802_v33  ;;  %3233 = vmatprep.subr.msk.bf16.mxu0 %vm3818_vm4, %v3231_v47 }
 0x2c6   :  { %3030 = vmatmul.mubr.msk.f32.vlgmr.msra.gmra.mrb[4].mxu0 %vm265_vm3, %v458_v49 }
 0x2c7   :  { %3236 = vmatpush3.bf16.xpose.msk.msra.mxu0 %vm3818_vm4, %v3231_v47  ;;  %3043 = vmatprep.mubr.msk.f32.mxu0 %vm265_vm3, %v659_v48 }
 0x2c8   :  { %v3325_v50 = vpop.permute.xlu1 %3324  ;;  %3067 = vmatprep.subr.bf16.mxu0 %v3526_v63 }
 0x2c9   :  { %v3327_v51 = vunpack.i.h.bf16 %v3325_v50  ;;  %v3326_v52 = vunpack.i.l.bf16 %v3325_v50 }
 0x2cb   :  { %v3217_v53 = vpack.c.bf16 %v3327_v51, %v3326_v52 }
 0x2cd   :  { %3218 = vmatprep.subr.bf16.mxu1 %v3217_v53 }
 0x2ce   :  { %3044 = vmatmul.mubr.msk.f32.vlgmr.msra.gmra.mrb[6].mxu0 %vm265_vm3, %v661_v54  ;;  %3220 = vmatpush3.bf16.msra.mxu1 %v3217_v53 }
 0x2cf   :  { %3071 = vmatprep.mubr.msk.bf16.mxu0 %vm3527_vm2, %v3526_v63 }
 0x398   :  { %v3017_v57 = vpop.f32.mrb[0].mxu1 }
 0x399   :  { %v348_v58 = vadd.f32 %v3017_v57, %v3846_v55  ;;  %v3031_v59 = vpop.f32.mrb[4].mxu0  ;;  %v342_v60 = vpop.f32.mrb[1].mxu1 }
 0x39a   :  { %v543_v61 = vadd.f32 %v3031_v59, %v3846_v55  ;;  %v343_v62 = vadd.f32 %v342_v60, %v3851_v56  ;;  %v537_v0 = vpop.f32.mrb[5].mxu0 }
 0x39b   :  { %v353_v1 = vmul.f32 1.442695, %v348_v58  ;;  %v538_v2 = vadd.f32 %v537_v0, %v3851_v56 }
 0x39c   :  { %v548_v3 = vmul.f32 1.442695, %v543_v61  ;;  %v351_v4 = vmul.f32 1.442695, %v343_v62 }
 0x39d   :  { %3418 = vpow2.f32 %v353_v1  ;;  %v546_v5 = vmul.f32 1.442695, %v538_v2 }
 0x39e   :  { %3420 = vpow2.f32 %v548_v3 }
 0x39f   :  { %3422 = vpow2.f32 %v351_v4 }
 0x3a0   :  { %3424 = vpow2.f32 %v546_v5 }
 0x3a1   :  { %v3045_v6 = vpop.f32.mrb[6].mxu0 }
 0x3a2   :  { %v746_v7 = vadd.f32 %v3045_v6, %v3846_v55  ;;  %v740_v10 = vpop.f32.mrb[7].mxu0 }
 0x3a3   :  { %v741_v26 = vadd.f32 %v740_v10, %v3851_v56 }
 0x3a4   :  { %v751_v11 = vmul.f32 1.442695, %v746_v7 }
 0x3a5   :  { %v749_v27 = vmul.f32 1.442695, %v741_v26 }
 0x3a6   :  { %3426 = vpow2.f32 %v751_v11 }
 0x3a7   :  { %v3419_v12 = vpop.eup %3418  ;;  %3428 = vpow2.f32 %v749_v27 }
 0x3a8   :  { %v3421_v13 = vpop.eup %3420  ;;  %v359_v15 = vsel %vm355_vm5, %v3419_v12, 0.0 }
 0x3a9   :  { %v3423_v16 = vpop.eup %3422  ;;  %360 = vadd.xlane.f32.xlu0 %v359_v15  ;;  %v553_v18 = vsel %vm355_vm5, %v3421_v13, 0.0 }
 0x3aa   :  { %v356_v17 = vsel %vm355_vm5, %v3423_v16, 0.0  ;;  %v3425_v19 = vpop.eup %3424 }
 0x3ab   :  { %357 = vadd.xlane.f32.xlu1 %v356_v17  ;;  %v550_v22 = vsel %vm355_vm5, %v3425_v19, 0.0 }
 0x3ad   :  { %554 = vadd.xlane.f32.xlu0 %v553_v18 }
 0x3b0   :  { %v3862_v24 = vpop.eup %3426 }
 0x3b1   :  { %551 = vadd.xlane.f32.xlu0 %v550_v22  ;;  %v756_v25 = vsel %vm355_vm5, %v3862_v24, 0.0  ;;  %v3429_v28 = vpop.eup %3428 }
 0x3b2   :  { %v753_v29 = vsel %vm355_vm5, %v3429_v28, 0.0 }
 0x3b5   :  { %757 = vadd.xlane.f32.xlu0 %v756_v25 }
 0x3bc   :  { %3334 = vrot.lane.b32.xlu1 %v3796_v32, %s3534_s3 }
 0x3c0   :  { %3339 = vrot.lane.b32.xlu1 %v3796_v32, %s3535_s24 }
 0x3cb   :  { %3329 = vrot.lane.b32.xlu0 %v3796_v32, %s3536_s27 }
 0x3cf   :  { %863 = vrot.lane.b32.xlu0 %v3802_v33, %s3537_s2 }
 0x3e4   :  { %754 = vadd.xlane.f32.xlu1 %v753_v29 }
 0x3f5   :  { %861 = vrot.lane.b32.xlu1 %v3792_v31, %s3537_s2 }
 0x436   :  { %v361_v30 = vpop.xlane.xlu0 %360 }
 0x437   :  { %3430 = vrcp.f32 %v361_v30 }
 0x438   :  { %v358_v34 = vpop.xlane.xlu1 %357 }
 0x439   :  { %3432 = vrcp.f32 %v358_v34 }
 0x43a   :  { %v555_v35 = vpop.xlane.xlu0 %554 }
 0x43c   :  { %v3335_v38 = vpop.permute.xlu1 %3334 }
 0x43d   :  { %v3337_v44 = vunpack.i.h.bf16 %v3335_v38  ;;  %v3336_v45 = vunpack.i.l.bf16 %v3335_v38 }
 0x43e   :  { %v552_v36 = vpop.xlane.xlu0 %551 }
 0x43f   :  { %3434 = vrcp.f32 %v552_v36  ;;  %v3237_v52 = vpack.c.bf16 %v3337_v44, %v3336_v45 }
 0x440   :  { %3436 = vrcp.f32 %v555_v35  ;;  %v3340_v47 = vpop.permute.xlu1 %3339 }
 0x441   :  { %v3431_v37 = vpop.eup %3430  ;;  %v3342_v53 = vunpack.i.h.bf16 %v3340_v47  ;;  %v3341_v54 = vunpack.i.l.bf16 %v3340_v47 }
 0x442   :  { %v758_v33 = vpop.xlane.xlu0 %757  ;;  %v365_v42 = vmul.f32 %v3431_v37, %v3419_v12 }
 0x443   :  { %v3433_v39 = vpop.eup %3432  ;;  %v3241_v58 = vpack.c.bf16 %v3342_v53, %v3341_v54  ;;  %3438 = vrcp.f32 %v758_v33 }
 0x444   :  { %v364_v41 = vmul.f32 %v3433_v39, %v3423_v16 }
 0x446   :  { %3022 = vmatprep.mubr.msk.f32.mxu1 %vm355_vm5, %v364_v41  ;;  %v3330_v43 = vpop.permute.xlu0 %3329  ;;  %v3390_v41 = vld [vmem:[%s4231_s6] sm:$0xff]  }
 0x447   :  { %3023 = vmatmul.mubr.msk.f32.vlgmr.msra.gmra.mrb[2].mxu1 %vm355_vm5, %v365_v42  ;;  %v3332_v31 = vunpack.i.h.bf16 %v3330_v43  ;;  %v3331_v46 = vunpack.i.l.bf16 %v3330_v43  ;;  %3068 = vmatpush3.bf16.msra.mxu0 %v3390_v41  ;;  %v3391_v42 = vld [vmem:[%s4231_s6 + $0x8] sm:$0xff]  }
 0x448   :  { %3069 = vmatprep.subr.bf16.mxu0 %v3526_v63 }
 0x449   :  { %v3435_v48 = vpop.eup %3434  ;;  %v3227_v49 = vpack.c.bf16 %v3332_v31, %v3331_v46 }
 0x44a   :  { %v3437_v50 = vpop.eup %3436  ;;  %v558_v51 = vmul.f32 %v3435_v48, %v3425_v19  ;;  %v864_v2 = vpop.permute.xlu0 %863 }
 0x44b   :  { %3228 = vmatprep.subr.bf16.mxu1 %v3227_v49  ;;  %v559_v57 = vmul.f32 %v3437_v50, %v3421_v13  ;;  %3070 = vmatpush3.bf16.msra.mxu0 %v3391_v42 }
 0x44c   :  { %3230 = vmatpush3.bf16.msra.mxu1 %v3227_v49  ;;  %3036 = vmatprep.mubr.msk.f32.mxu1 %vm355_vm5, %v558_v51  ;;  %v1074_v49 = vrot.slane %v3788_v23, %v3775_v14 }
 0x44d   :  { %3238 = vmatprep.subr.bf16.mxu1 %v3237_v52  ;;  %v3439_v60 = vpop.eup %3438  ;;  %3083 = vmatprep.subr.bf16.mxu0 %v3526_v63 }
 0x44e   :  { %v762_v0 = vmul.f32 %v3439_v60, %v3862_v24 }
 0x44f   :  { %3037 = vmatmul.mubr.msk.f32.vlgmr.msra.gmra.mrb[4].mxu1 %vm355_vm5, %v559_v57 }
 0x450   :  { %3240 = vmatpush3.bf16.msra.mxu1 %v3237_v52 }
 0x451   :  { %3243 = vmatprep.subr.msk.bf16.mxu1 %vm3818_vm4, %v3241_v58 }
 0x471   :  { %v755_v59 = vpop.xlane.xlu1 %754 }
 0x472   :  { %3440 = vrcp.f32 %v755_v59 }
 0x475   :  { %v862_v1 = vpop.permute.xlu1 %861 }
 0x47c   :  { %v3441_v61 = vpop.eup %3440 }
 0x47d   :  { %v761_v62 = vmul.f32 %v3441_v61, %v3429_v28 }
 0x47f   :  { %3050 = vmatprep.mubr.msk.f32.mxu1 %vm355_vm5, %v761_v62 }
 0x480   :  { %3051 = vmatmul.mubr.msk.f32.vlgmr.msra.gmra.mrb[6].mxu1 %vm355_vm5, %v762_v0 }
 0x481   :  { %3246 = vmatpush3.bf16.xpose.msk.msra.mxu1 %vm3818_vm4, %v3241_v58  ;;  %3057 = vmatprep.mubr.msk.f32.mxu1 %vm265_vm3, %v862_v1 }
 0x488   :  { %3058 = vmatmul.mubr.msk.f32.vlgmr.msra.gmra.mrb[8].mxu1 %vm265_vm3, %v864_v2 }
 0x51a   :  { %v3024_v3 = vpop.f32.mrb[2].mxu1 }
 0x51b   :  { %454 = vst.msk [vmem:[#allocation3 + $0x8] sm:$0xff] %vm265_vm3, %v3024_v3  ;;  %v444_v4 = vpop.f32.mrb[3].mxu1 }
 0x51c   :  { %453 = vst.msk [vmem:[#allocation3] sm:$0xff] %vm265_vm3, %v444_v4 }
 0x522   :  { %v3038_v5 = vpop.f32.mrb[4].mxu1 }
 0x523   :  { %v638_v6 = vpop.f32.mrb[5].mxu1 }
 0x553   :  { %v3052_v7 = vpop.f32.mrb[6].mxu1 }
 0x554   :  { %v841_v10 = vpop.f32.mrb[7].mxu1 }
 0x55b   :  { %v3059_v11 = vpop.f32.mrb[8].mxu1 }
 0x55c   :  { %v949_v12 = vadd.f32 %v3059_v11, %v3846_v55  ;;  %v943_v13 = vpop.f32.mrb[9].mxu1 }
 0x55d   :  { %v944_v15 = vadd.f32 %v943_v13, %v3851_v56 }
 0x55e   :  { %v954_v16 = vmul.f32 1.442695, %v949_v12 }
 0x55f   :  { %v952_v17 = vmul.f32 1.442695, %v944_v15 }
 0x560   :  { %3442 = vpow2.f32 %v954_v16 }
 0x561   :  { %3444 = vpow2.f32 %v952_v17 }
 0x56a   :  { %v3443_v18 = vpop.eup %3442 }
 0x56b   :  { %v3445_v19 = vpop.eup %3444  ;;  %v959_v22 = vsel %vm355_vm5, %v3443_v18, 0.0 }
 0x56c   :  { %960 = vadd.xlane.f32.xlu0 %v959_v22  ;;  %v956_v24 = vsel %vm355_vm5, %v3445_v19, 0.0 }
 0x56d   :  { %957 = vadd.xlane.f32.xlu1 %v956_v24 }
 0x57e   :  { %649 = vrot.lane.b32.xlu1 %v638_v6, %s3538_s28 }
 0x582   :  { %3344 = vrot.lane.b32.xlu0 %v3796_v32, %s3539_s22  ;;  %651 = vrot.lane.b32.xlu1 %v3038_v5, %s3538_s28 }
 0x586   :  { %852 = vrot.lane.b32.xlu0 %v841_v10, %s3540_s1  ;;  %854 = vrot.lane.b32.xlu1 %v3052_v7, %s3540_s1  ;;  %v3393_v10 = vld [vmem:[%s4232_s7 + $0x8] sm:$0xff]  }
 0x5f9   :  { %v961_v25 = vpop.xlane.xlu0 %960 }
 0x5fa   :  { %3446 = vrcp.f32 %v961_v25  ;;  %v958_v26 = vpop.xlane.xlu1 %957  ;;  %v3949_v25 = vsub.s32 3, %v3765_v8 }
 0x5fb   :  { %3448 = vrcp.f32 %v958_v26 }
 0x5fd   :  { %v3345_v27 = vpop.permute.xlu0 %3344 }
 0x5fe   :  { %v3347_v28 = vunpack.i.h.bf16 %v3345_v27  ;;  %v3346_v29 = vunpack.i.l.bf16 %v3345_v27  ;;  %v650_v30 = vpop.permute.xlu1 %649 }
 0x5ff   :  { %656 = vst.msk [vmem:[#allocation3] sm:$0xff] %vm655_vm6, %v650_v30 }
 0x600   :  { %v3247_v32 = vpack.c.bf16 %v3347_v28, %v3346_v29  ;;  %v1168_v29 = vrot.slane %v3788_v23, %v3949_v25 }
 0x601   :  { %v853_v34 = vpop.permute.xlu0 %852 }
 0x602   :  { %859 = vst.msk [vmem:[#allocation3] sm:$0xff] %vm858_vm7, %v853_v34  ;;  %3248 = vmatprep.subr.bf16.mxu1 %v3247_v32  ;;  %v652_v35 = vpop.permute.xlu1 %651 }
 0x603   :  { %657 = vst.msk [vmem:[#allocation3 + $0x8] sm:$0xff] %vm655_vm6, %v652_v35  ;;  %3250 = vmatpush3.bf16.msra.mxu1 %v3247_v32 }
 0x604   :  { %v3447_v36 = vpop.eup %3446  ;;  %3075 = vmatprep.subr.bf16.mxu1 %v3526_v63 }
 0x605   :  { %v3449_v37 = vpop.eup %3448  ;;  %v965_v39 = vmul.f32 %v3447_v36, %v3443_v18  ;;  %v3944_v18 = vsub.s32 2, %v3765_v8  ;;  %v3394_v36 = vld [vmem:[%s4233_s8] sm:$0xff]  }
 0x606   :  { %v855_v38 = vpop.permute.xlu1 %854  ;;  %v964_v33 = vmul.f32 %v3449_v37, %v3445_v19  ;;  %v3395_v37 = vld [vmem:[%s4233_s8 + $0x8] sm:$0xff]  }
 0x607   :  { %860 = vst.msk [vmem:[#allocation3 + $0x8] sm:$0xff] %vm858_vm7, %v855_v38  ;;  %v1162_v22 = vrot.slane %v3788_v23, %v3944_v18  ;;  %v3396_v38 = vld [vmem:[%s4233_s8 + $0x10] sm:$0xff]  }
 0x608   :  { %3064 = vmatprep.mubr.msk.f32.mxu1 %vm355_vm5, %v964_v33  ;;  %v3397_v33 = vld [vmem:[%s4233_s8 + $0x18] sm:$0xff]  }
 0x609   :  { %3065 = vmatmul.mubr.msk.f32.vlgmr.msra.gmra.mrb[10].mxu1 %vm355_vm5, %v965_v39  ;;  %v3972_v39 = vsub.s32 4, %v3765_v8 }
 0x60a   :  { %3079 = vmatprep.mubr.msk.bf16.mxu1 %vm3527_vm2, %v3526_v63 }
 0x60b   :  { %v1179_v41 = vrot.slane %v3788_v23, %v3972_v39 }
 0x6dc   :  { %v3066_v43 = vpop.f32.mrb[10].mxu1 }
 0x6dd   :  { %1057 = vrot.lane.b32.xlu1 %v3066_v43, %s3541_s12  ;;  %v1044_v44 = vpop.f32.mrb[11].mxu1 }
 0x6de   :  { %1055 = vrot.lane.b32.xlu0 %v1044_v44, %s3541_s12 }
 0x74f   :  { %v1058_v45 = vpop.permute.xlu1 %1057 }
 0x750   :  { %1063 = vst.msk [vmem:[#allocation3 + $0x8] sm:$0xff] %vm1061_vm8, %v1058_v45  ;;  %v1056_v31 = vpop.permute.xlu0 %1055 }
 0x751   :  { %1062 = vst.msk [vmem:[#allocation3] sm:$0xff] %vm1061_vm8, %v1056_v31 }
 0x757   :  { %v1065_v46 = vld [vmem:[#allocation3 + $0x8] sm:$0xff] }
 0x758   :  { %v1064_v47 = vld [vmem:[#allocation3] sm:$0xff] }
 0x759   :  { %v1066_v48 = vpack.c.bf16 %v1065_v46, %v1064_v47 }
 0x75b   :  { %3072 = vmatmul.mubr.msk.bf16.vlgmr.msra.gmra.mrb[8].mxu0 %vm149_vm1, %v1066_v48 }
 0x75c   :  { %3091 = vmatprep.mubr.msk.bf16.mxu0 %vm3527_vm2, %v3526_v63  ;;  %3084 = vmatpush3.bf16.msra.mxu0 %v3394_v36  ;;  %v3399_v36 = vld [vmem:[%s4230_s5 + $0x18] sm:$0xff]  }
 0x75d   :  { %3085 = vmatprep.subr.bf16.mxu0 %v3526_v63 }
 0x760   :  { %3086 = vmatpush3.bf16.msra.mxu0 %v3395_v37 }
 0x761   :  { %3087 = vmatprep.subr.bf16.mxu0 %v3526_v63 }
 0x764   :  { %3088 = vmatpush3.bf16.msra.mxu0 %v3396_v38 }
 0x765   :  { %3089 = vmatprep.subr.bf16.mxu0 %v3526_v63 }
 0x768   :  { %3090 = vmatpush3.bf16.msra.mxu0 %v3397_v33 }
 0x82e   :  { %v1124_v50 = vpop.f32.mrb[8].mxu0 }
 0x82f   :  { %v1125_v51 = vadd.f32 %v1124_v50, %v1074_v49  ;;  %v3073_v52 = vpop.f32.mrb[9].mxu0 }
 0x830   :  { %v1127_v53 = vpop.f32.mrb[10].mxu0 }
 0x831   :  { %v1128_v54 = vadd.f32 %v1127_v53, %v1074_v49  ;;  %v3074_v57 = vpop.f32.mrb[11].mxu0  ;;  %v1131_v58 = vadd.f32 %v1125_v51, %v3778_v20 }
 0x833   :  { %v1133_v59 = vsel %vm149_vm1, %v1131_v58, 0.0  ;;  %v1132_v60 = vadd.f32 %v1128_v54, %v3780_v21  ;;  %v3392_v21 = vld [vmem:[%s4232_s7] sm:$0xff]  }
 0x834   :  { %1134 = vadd.xlane.f32.xlu0 %v1133_v59  ;;  %3076 = vmatpush3.bf16.msra.mxu1 %v3392_v21 }
 0x835   :  { %v1136_v61 = vsel %vm149_vm1, %v1132_v60, 0.0  ;;  %3077 = vmatprep.subr.bf16.mxu1 %v3526_v63 }
 0x836   :  { %1137 = vadd.xlane.f32.xlu1 %v1136_v61 }
 0x838   :  { %3078 = vmatpush3.bf16.msra.mxu1 %v3393_v10 }
 0x839   :  { %3095 = vmatprep.subr.bf16.mxu1 %v3526_v63 }
 0x8c1   :  { %v1135_v62 = vpop.xlane.xlu0 %1134 }
 0x8c2   :  { %v1139_v0 = vmul.f32 0.03125, %v1135_v62 }
 0x8c3   :  { %v1138_v1 = vpop.xlane.xlu1 %1137 }
 0x8c4   :  { %v1141_v2 = vsub.f32 %v1131_v58, %v1139_v0  ;;  %v1140_v3 = vmul.f32 0.03125, %v1138_v1 }
 0x8c6   :  { %v1142_v4 = vsub.f32 %v1132_v60, %v1140_v3  ;;  %v1143_v5 = vmul.f32 %v1141_v2, %v1141_v2 }
 0x8c8   :  { %v1145_v6 = vsel %vm149_vm1, %v1143_v5, 0.0  ;;  %v1144_v7 = vmul.f32 %v1142_v4, %v1142_v4  ;;  %v1265_v5 = vsub.s32 5, %v3765_v8 }
 0x8c9   :  { %1146 = vadd.xlane.f32.xlu0 %v1145_v6 }
 0x8ca   :  { %v1148_v20 = vsel %vm149_vm1, %v1144_v7, 0.0  ;;  %v1266_v6 = vrot.slane %v3788_v23, %v1265_v5 }
 0x8cd   :  { %1149 = vadd.xlane.f32.xlu0 %v1148_v20 }
 0x956   :  { %v1147_v11 = vpop.xlane.xlu0 %1146 }
 0x957   :  { %v1151_v12 = vmul.f32 0.03125, %v1147_v11 }
 0x959   :  { %v1153_v13 = vadd.f32 1e-12, %v1151_v12 }
 0x95a   :  { %v1150_v15 = vpop.xlane.xlu0 %1149 }
 0x95b   :  { %3450 = vrsqrt.f32 %v1153_v13  ;;  %v1152_v16 = vmul.f32 0.03125, %v1150_v15 }
 0x95d   :  { %v1154_v17 = vadd.f32 1e-12, %v1152_v16 }
 0x95f   :  { %3452 = vrsqrt.f32 %v1154_v17 }
 0x965   :  { %v3451_v19 = vpop.eup %3450 }
 0x966   :  { %v1157_v24 = vmul.f32 %v3451_v19, %v1141_v2 }
 0x968   :  { %v1163_v27 = vmul.f32 %v1162_v22, %v1157_v24 }
 0x969   :  { %v3453_v26 = vpop.eup %3452 }
 0x96a   :  { %v1158_v28 = vmul.f32 %v3453_v26, %v1142_v4  ;;  %v1169_v32 = vadd.f32 %v1168_v29, %v1163_v27 }
 0x96c   :  { %v1164_v30 = vmul.f32 %v1162_v22, %v1158_v28 }
 0x96e   :  { %v1170_v34 = vadd.f32 %v1168_v29, %v1164_v30 }
 0x970   :  { %v1171_v35 = vpack.c.bf16 %v1170_v34, %v1169_v32 }
 0x972   :  { %3080 = vmatmul.mubr.msk.bf16.vlgmr.msra.gmra.mrb[12].mxu1 %vm149_vm1, %v1171_v35 }
 0x973   :  { %3099 = vmatprep.mubr.msk.bf16.mxu1 %vm3527_vm2, %v3526_v63 }
 0xa45   :  { %v1229_v42 = vpop.f32.mrb[12].mxu1 }
 0xa46   :  { %v1230_v43 = vadd.f32 %v1229_v42, %v1179_v41  ;;  %v3081_v44 = vpop.f32.mrb[13].mxu1 }
 0xa47   :  { %v1232_v45 = vpop.f32.mrb[14].mxu1  ;;  %v1366_v44 = vsub.s32 6, %v3765_v8 }
 0xa48   :  { %v1238_v31 = vmul.f32 0.044715, %v1230_v43  ;;  %v1233_v46 = vadd.f32 %v1232_v45, %v1179_v41  ;;  %v3082_v47 = vpop.f32.mrb[15].mxu1  ;;  %v1236_v62 = vmul.f32 0.5, %v1230_v43 }
 0xa49   :  { %v1367_v45 = vrot.slane %v3788_v23, %v1366_v44 }
 0xa4a   :  { %v1240_v48 = vmul.f32 %v1238_v31, %v1230_v43  ;;  %v1239_v49 = vmul.f32 0.044715, %v1233_v46  ;;  %v1237_v0 = vmul.f32 0.5, %v1233_v46  ;;  %v1372_v31 = vsub.s32 7, %v3765_v8  ;;  %v3411_v8 = vld [vmem:[%s4247_s30 + $0x8] sm:$0xff]  }
 0xa4c   :  { %v1242_v50 = vmul.f32 %v1240_v48, %v1230_v43  ;;  %v1241_v51 = vmul.f32 %v1239_v49, %v1233_v46 }
 0xa4e   :  { %v1244_v52 = vadd.f32 %v1242_v50, %v1230_v43  ;;  %v1243_v53 = vmul.f32 %v1241_v51, %v1233_v46  ;;  %v1373_v51 = vrot.slane %v3788_v23, %v1372_v31 }
 0xa50   :  { %v1246_v54 = vmul.f32 0.7978846, %v1244_v52  ;;  %v1245_v57 = vadd.f32 %v1243_v53, %v1233_v46 }
 0xa52   :  { %3454 = vtanh.f32 %v1246_v54  ;;  %v1247_v58 = vmul.f32 0.7978846, %v1245_v57 }
 0xa54   :  { %3456 = vtanh.f32 %v1247_v58  ;;  %v4010_v58 = vld [vmem:[%s4234_s9 + $0x8] sm:$0xff] }
 0xa5c   :  { %v3455_v59 = vpop.eup %3454 }
 0xa5d   :  { %v1250_v60 = vadd.f32 1.0, %v3455_v59  ;;  %v1387_v59 = vrot.slane %v4010_v58, %v3768_v9 }
 0xa5e   :  { %v3457_v61 = vpop.eup %3456 }
 0xa5f   :  { %v1251_v1 = vadd.f32 1.0, %v3457_v61  ;;  %v1252_v2 = vmul.f32 %v1250_v60, %v1236_v62 }
 0xa61   :  { %v1253_v3 = vmul.f32 %v1251_v1, %v1237_v0 }
 0xa63   :  { %v1254_v4 = vpack.c.bf16 %v1253_v3, %v1252_v2 }
 0xa65   :  { %3092 = vmatmul.mubr.msk.bf16.vlgmr.msra.gmra.mrb[12].mxu0 %vm1291_vm9, %v1254_v4 }
 0xb38   :  { %v1329_v7 = vpop.f32.mrb[12].mxu0 }
 0xb39   :  { %v1330_v20 = vadd.f32 %v1329_v7, %v1266_v6  ;;  %v3093_v21 = vpop.f32.mrb[13].mxu0 }
 0xb3a   :  { %v1332_v10 = vpop.f32.mrb[14].mxu0 }
 0xb3b   :  { %v1333_v11 = vadd.f32 %v1332_v10, %v1266_v6  ;;  %v3094_v12 = vpop.f32.mrb[15].mxu0  ;;  %v1336_v13 = vadd.f32 %v1330_v20, %v1169_v32 }
 0xb3d   :  { %v1338_v15 = vsel %vm149_vm1, %v1336_v13, 0.0  ;;  %v1337_v16 = vadd.f32 %v1333_v11, %v1170_v34  ;;  %v3398_v34 = vld [vmem:[%s4230_s5 + $0x10] sm:$0xff]  }
 0xb3e   :  { %1339 = vadd.xlane.f32.xlu0 %v1338_v15  ;;  %3096 = vmatpush3.bf16.msra.mxu1 %v3398_v34 }
 0xb3f   :  { %v1341_v17 = vsel %vm149_vm1, %v1337_v16, 0.0  ;;  %3097 = vmatprep.subr.bf16.mxu1 %v3526_v63 }
 0xb40   :  { %1342 = vadd.xlane.f32.xlu1 %v1341_v17 }
 0xb42   :  { %3098 = vmatpush3.bf16.msra.mxu1 %v3399_v36 }
 0xbcb   :  { %v1340_v19 = vpop.xlane.xlu0 %1339 }
 0xbcc   :  { %v1344_v22 = vmul.f32 0.03125, %v1340_v19 }
 0xbcd   :  { %v1343_v24 = vpop.xlane.xlu1 %1342 }
 0xbce   :  { %v1346_v26 = vsub.f32 %v1336_v13, %v1344_v22  ;;  %v1345_v27 = vmul.f32 0.03125, %v1343_v24 }
 0xbd0   :  { %v1347_v28 = vsub.f32 %v1337_v16, %v1345_v27  ;;  %v1348_v29 = vmul.f32 %v1346_v26, %v1346_v26 }
 0xbd2   :  { %v1350_v30 = vsel %vm149_vm1, %v1348_v29, 0.0  ;;  %v1349_v35 = vmul.f32 %v1347_v28, %v1347_v28 }
 0xbd3   :  { %1351 = vadd.xlane.f32.xlu0 %v1350_v30 }
 0xbd4   :  { %v1353_v32 = vsel %vm149_vm1, %v1349_v35, 0.0 }
 0xbd5   :  { %1354 = vadd.xlane.f32.xlu1 %v1353_v32 }
 0xc60   :  { %v1352_v37 = vpop.xlane.xlu0 %1351 }
 0xc61   :  { %v1356_v38 = vmul.f32 0.03125, %v1352_v37 }
 0xc62   :  { %v1355_v33 = vpop.xlane.xlu1 %1354 }
 0xc63   :  { %v1358_v41 = vadd.f32 1e-12, %v1356_v38  ;;  %v1357_v42 = vmul.f32 0.03125, %v1355_v33 }
 0xc65   :  { %3458 = vrsqrt.f32 %v1358_v41  ;;  %v1359_v43 = vadd.f32 1e-12, %v1357_v42 }
 0xc67   :  { %3460 = vrsqrt.f32 %v1359_v43 }
 0xc6f   :  { %v3459_v46 = vpop.eup %3458 }
 0xc70   :  { %v1362_v47 = vmul.f32 %v3459_v46, %v1346_v26 }
 0xc71   :  { %v3461_v48 = vpop.eup %3460 }
 0xc72   :  { %v1368_v49 = vmul.f32 %v1367_v45, %v1362_v47  ;;  %v1363_v50 = vmul.f32 %v3461_v48, %v1347_v28 }
 0xc74   :  { %v1369_v52 = vmul.f32 %v1367_v45, %v1363_v50  ;;  %v4000_v53 = vadd.f32 %v1373_v51, %v1368_v49 }
 0xc76   :  { %v4002_v54 = vadd.f32 %v1373_v51, %v1369_v52 }
 0xc78   :  { %v1378_v57 = vpack.c.bf16 %v4002_v54, %v4000_v53 }
 0xc7a   :  { %3100 = vmatmul.mubr.msk.bf16.vlgmr.msra.gmra.mrb[16].mxu1 %vm149_vm1, %v1378_v57 }
 0xd4d   :  { %v1437_v60 = vpop.f32.mrb[16].mxu1 }
 0xd4e   :  { %v1438_v23 = vadd.f32 %v1437_v60, %v1387_v59  ;;  %v3101_v61 = vpop.f32.mrb[17].mxu1 }
 0xd4f   :  { %v1440_v62 = vpop.f32.mrb[18].mxu1 }
 0xd50   :  { %v1441_v0 = vadd.f32 %v1440_v62, %v1387_v59  ;;  %v3102_v1 = vpop.f32.mrb[19].mxu1  ;;  %v4014_v2 = vmul.f32 0.35355338, %v1438_v23 }
 0xd52   :  { %3107 = vmatprep.mubr.msk.f32.mxu1 %vm265_vm3, %v4014_v2  ;;  %v4018_v3 = vpack.i.bf16 %v1441_v0, %v1438_v23  ;;  %v4024_v9 = vmul.f32 0.35355338, %v1441_v0 }
 0xd54   :  { %3354 = vrot.lane.b32.xlu1 %v4018_v3, %s3528_s25  ;;  %3349 = vrot.lane.b32.xlu0 %v4018_v3, %s3529_s17 }
 0xd58   :  { %1640 = vrot.lane.b32.xlu1 %v4014_v2, %s3530_s16  ;;  %1642 = vrot.lane.b32.xlu0 %v4024_v9, %s3530_s16  ;;  %s4249_s16 = sld [smem:[#allocation9_spill]] }
 0xd5c   :  { %3359 = vrot.lane.b32.xlu1 %v4018_v3, %s3531_s18  ;;  %1844 = vrot.lane.b32.xlu0 %v4024_v9, %s3532_s20 }
 0xd60   :  { %1842 = vrot.lane.b32.xlu1 %v4014_v2, %s3532_s20 }
 0xd64   :  { %3364 = vrot.lane.b32.xlu1 %v4018_v3, %s3533_s21 }
 0xdc6   :  { %v3355_v4 = vpop.permute.xlu1 %3354  ;;  %v3350_v6 = vpop.permute.xlu0 %3349 }
 0xdc7   :  { %v3357_v7 = vunpack.i.h.bf16 %v3355_v4  ;;  %v3356_v20 = vunpack.i.l.bf16 %v3355_v4  ;;  %v3352_v21 = vunpack.i.h.bf16 %v3350_v6  ;;  %v3351_v10 = vunpack.i.l.bf16 %v3350_v6 }
 0xdc9   :  { %v3261_v11 = vpack.c.bf16 %v3357_v7, %v3356_v20  ;;  %v3251_v12 = vpack.c.bf16 %v3352_v21, %v3351_v10 }
 0xdca   :  { %v1641_v13 = vpop.permute.xlu1 %1640  ;;  %v1643_v24 = vpop.permute.xlu0 %1642 }
 0xdcb   :  { %3253 = vmatprep.subr.msk.bf16.mxu1 %vm3818_vm4, %v3251_v12  ;;  %3263 = vmatprep.subr.msk.bf16.mxu0 %vm3818_vm4, %v3261_v11 }
 0xdcc   :  { %3121 = vmatprep.mubr.msk.f32.mxu0 %vm265_vm3, %v1641_v13  ;;  %3256 = vmatpush3.bf16.xpose.msk.msra.mxu1 %vm3818_vm4, %v3251_v12 }
 0xdcd   :  { %3266 = vmatpush3.bf16.xpose.msk.msra.mxu0 %vm3818_vm4, %v3261_v11 }
 0xdce   :  { %v3360_v15 = vpop.permute.xlu1 %3359  ;;  %v1845_v30 = vpop.permute.xlu0 %1844 }
 0xdcf   :  { %v3362_v16 = vunpack.i.h.bf16 %v3360_v15  ;;  %v3361_v17 = vunpack.i.l.bf16 %v3360_v15 }
 0xdd1   :  { %v3271_v19 = vpack.c.bf16 %v3362_v16, %v3361_v17 }
 0xdd2   :  { %v1843_v22 = vpop.permute.xlu1 %1842 }
 0xdd3   :  { %3108 = vmatmul.mubr.msk.f32.vlgmr.msra.gmra.mrb[20].mxu1 %vm265_vm3, %v4024_v9  ;;  %3273 = vmatprep.subr.msk.bf16.mxu0 %vm3818_vm4, %v3271_v19 }
 0xdd4   :  { %3122 = vmatmul.mubr.msk.f32.vlgmr.msra.gmra.mrb[16].mxu0 %vm265_vm3, %v1643_v24 }
 0xdd5   :  { %3276 = vmatpush3.bf16.xpose.msk.msra.mxu0 %vm3818_vm4, %v3271_v19  ;;  %3135 = vmatprep.mubr.msk.f32.mxu0 %vm265_vm3, %v1843_v22 }
 0xdd6   :  { %v3365_v26 = vpop.permute.xlu1 %3364 }
 0xdd7   :  { %v3367_v27 = vunpack.i.h.bf16 %v3365_v26  ;;  %v3366_v28 = vunpack.i.l.bf16 %v3365_v26 }
 0xdd9   :  { %v3257_v29 = vpack.c.bf16 %v3367_v27, %v3366_v28 }
 0xddb   :  { %3258 = vmatprep.subr.bf16.mxu1 %v3257_v29 }
 0xddc   :  { %3136 = vmatmul.mubr.msk.f32.vlgmr.msra.gmra.mrb[18].mxu0 %vm265_vm3, %v1845_v30  ;;  %3260 = vmatpush3.bf16.msra.mxu1 %v3257_v29 }
 0xea6   :  { %v3109_v35 = vpop.f32.mrb[20].mxu1 }
 0xea7   :  { %v1534_v32 = vadd.f32 %v3109_v35, %v3846_v55  ;;  %v3123_v34 = vpop.f32.mrb[16].mxu0  ;;  %v1528_v36 = vpop.f32.mrb[21].mxu1 }
 0xea8   :  { %v1728_v37 = vadd.f32 %v3123_v34, %v3846_v55  ;;  %v1529_v38 = vadd.f32 %v1528_v36, %v3851_v56  ;;  %v1722_v33 = vpop.f32.mrb[17].mxu0 }
 0xea9   :  { %v1539_v41 = vmul.f32 1.442695, %v1534_v32  ;;  %v1723_v42 = vadd.f32 %v1722_v33, %v3851_v56 }
 0xeaa   :  { %v1733_v43 = vmul.f32 1.442695, %v1728_v37  ;;  %v1537_v45 = vmul.f32 1.442695, %v1529_v38 }
 0xeab   :  { %3462 = vpow2.f32 %v1539_v41  ;;  %v1731_v46 = vmul.f32 1.442695, %v1723_v42 }
 0xeac   :  { %3464 = vpow2.f32 %v1733_v43 }
 0xead   :  { %3466 = vpow2.f32 %v1537_v45 }
 0xeae   :  { %3468 = vpow2.f32 %v1731_v46 }
 0xeaf   :  { %v3137_v47 = vpop.f32.mrb[18].mxu0 }
 0xeb0   :  { %v1930_v48 = vadd.f32 %v3137_v47, %v3846_v55  ;;  %v1924_v49 = vpop.f32.mrb[19].mxu0 }
 0xeb1   :  { %v1925_v4 = vadd.f32 %v1924_v49, %v3851_v56 }
 0xeb2   :  { %v1935_v50 = vmul.f32 1.442695, %v1930_v48 }
 0xeb3   :  { %v1933_v6 = vmul.f32 1.442695, %v1925_v4 }
 0xeb4   :  { %3470 = vpow2.f32 %v1935_v50 }
 0xeb5   :  { %v3463_v51 = vpop.eup %3462  ;;  %3472 = vpow2.f32 %v1933_v6 }
 0xeb6   :  { %v3465_v52 = vpop.eup %3464  ;;  %v1544_v57 = vsel %vm355_vm5, %v3463_v51, 0.0 }
 0xeb7   :  { %v3467_v59 = vpop.eup %3466  ;;  %1545 = vadd.xlane.f32.xlu0 %v1544_v57  ;;  %v1738_v23 = vsel %vm355_vm5, %v3465_v52, 0.0 }
 0xeb8   :  { %v1541_v60 = vsel %vm355_vm5, %v3467_v59, 0.0  ;;  %v3469_v61 = vpop.eup %3468 }
 0xeb9   :  { %1542 = vadd.xlane.f32.xlu1 %v1541_v60  ;;  %v1735_v62 = vsel %vm355_vm5, %v3469_v61, 0.0 }
 0xebb   :  { %1739 = vadd.xlane.f32.xlu0 %v1738_v23 }
 0xebe   :  { %v3471_v0 = vpop.eup %3470 }
 0xebf   :  { %1736 = vadd.xlane.f32.xlu0 %v1735_v62  ;;  %v1940_v1 = vsel %vm355_vm5, %v3471_v0, 0.0  ;;  %v3473_v7 = vpop.eup %3472 }
 0xec0   :  { %v1937_v20 = vsel %vm355_vm5, %v3473_v7, 0.0 }
 0xec3   :  { %1941 = vadd.xlane.f32.xlu0 %v1940_v1 }
 0xeca   :  { %3374 = vrot.lane.b32.xlu1 %v4018_v3, %s3534_s3 }
 0xece   :  { %3379 = vrot.lane.b32.xlu1 %v4018_v3, %s3535_s24 }
 0xed9   :  { %3369 = vrot.lane.b32.xlu0 %v4018_v3, %s3536_s27 }
 0xedd   :  { %2046 = vrot.lane.b32.xlu0 %v4024_v9, %s3537_s2 }
 0xef2   :  { %1938 = vadd.xlane.f32.xlu1 %v1937_v20 }
 0xf03   :  { %2044 = vrot.lane.b32.xlu1 %v4014_v2, %s3537_s2 }
 0xf44   :  { %v1546_v21 = vpop.xlane.xlu0 %1545 }
 0xf45   :  { %3474 = vrcp.f32 %v1546_v21 }
 0xf46   :  { %v1543_v10 = vpop.xlane.xlu1 %1542 }
 0xf47   :  { %3476 = vrcp.f32 %v1543_v10 }
 0xf48   :  { %v1740_v11 = vpop.xlane.xlu0 %1739 }
 0xf4a   :  { %v3375_v15 = vpop.permute.xlu1 %3374 }
 0xf4b   :  { %v3377_v24 = vunpack.i.h.bf16 %v3375_v15  ;;  %v3376_v26 = vunpack.i.l.bf16 %v3375_v15 }
 0xf4c   :  { %v1737_v12 = vpop.xlane.xlu0 %1736 }
 0xf4d   :  { %3478 = vrcp.f32 %v1737_v12  ;;  %v3277_v34 = vpack.c.bf16 %v3377_v24, %v3376_v26  ;;  %v3401_v24 = vld [vmem:[%s4231_s6 + $0x18] sm:$0xff]  }
 0xf4e   :  { %3480 = vrcp.f32 %v1740_v11  ;;  %v3380_v28 = vpop.permute.xlu1 %3379 }
 0xf4f   :  { %v3475_v13 = vpop.eup %3474  ;;  %v3382_v36 = vunpack.i.h.bf16 %v3380_v28  ;;  %v3381_v37 = vunpack.i.l.bf16 %v3380_v28 }
 0xf50   :  { %v1942_v9 = vpop.xlane.xlu0 %1941  ;;  %v1550_v19 = vmul.f32 %v3475_v13, %v3463_v51 }
 0xf51   :  { %v3477_v16 = vpop.eup %3476  ;;  %v3281_v33 = vpack.c.bf16 %v3382_v36, %v3381_v37  ;;  %3482 = vrcp.f32 %v1942_v9 }
 0xf52   :  { %v1549_v17 = vmul.f32 %v3477_v16, %v3467_v59 }
 0xf54   :  { %3114 = vmatprep.mubr.msk.f32.mxu1 %vm355_vm5, %v1549_v17  ;;  %v3370_v22 = vpop.permute.xlu0 %3369 }
 0xf55   :  { %3115 = vmatmul.mubr.msk.f32.vlgmr.msra.gmra.mrb[22].mxu1 %vm355_vm5, %v1550_v19  ;;  %v3372_v2 = vunpack.i.h.bf16 %v3370_v22  ;;  %v3371_v27 = vunpack.i.l.bf16 %v3370_v22  ;;  %v3400_v22 = vld [vmem:[%s4231_s6 + $0x10] sm:$0xff]  }
 0xf57   :  { %v3479_v29 = vpop.eup %3478  ;;  %v3267_v30 = vpack.c.bf16 %v3372_v2, %v3371_v27 }
 0xf58   :  { %v3481_v35 = vpop.eup %3480  ;;  %v1743_v32 = vmul.f32 %v3479_v29, %v3469_v61  ;;  %v2047_v48 = vpop.permute.xlu0 %2046 }
 0xf59   :  { %3268 = vmatprep.subr.bf16.mxu1 %v3267_v30  ;;  %v1744_v38 = vmul.f32 %v3481_v35, %v3465_v52 }
 0xf5a   :  { %3270 = vmatpush3.bf16.msra.mxu1 %v3267_v30  ;;  %3128 = vmatprep.mubr.msk.f32.mxu1 %vm355_vm5, %v1743_v32  ;;  %v2257_v32 = vrot.slane %v4010_v58, %v3775_v14 }
 0xf5b   :  { %3278 = vmatprep.subr.bf16.mxu1 %v3277_v34  ;;  %v3483_v42 = vpop.eup %3482 }
 0xf5c   :  { %v1946_v46 = vmul.f32 %v3483_v42, %v3471_v0 }
 0xf5d   :  { %3129 = vmatmul.mubr.msk.f32.vlgmr.msra.gmra.mrb[24].mxu1 %vm355_vm5, %v1744_v38 }
 0xf5e   :  { %3280 = vmatpush3.bf16.msra.mxu1 %v3277_v34 }
 0xf5f   :  { %3283 = vmatprep.subr.msk.bf16.mxu1 %vm3818_vm4, %v3281_v33 }
 0xf7f   :  { %v1939_v41 = vpop.xlane.xlu1 %1938 }
 0xf80   :  { %3484 = vrcp.f32 %v1939_v41 }
 0xf83   :  { %v2045_v47 = vpop.permute.xlu1 %2044 }
 0xf8a   :  { %v3485_v43 = vpop.eup %3484 }
 0xf8b   :  { %v1945_v45 = vmul.f32 %v3485_v43, %v3473_v7 }
 0xf8d   :  { %3142 = vmatprep.mubr.msk.f32.mxu1 %vm355_vm5, %v1945_v45 }
 0xf8e   :  { %3143 = vmatmul.mubr.msk.f32.vlgmr.msra.gmra.mrb[26].mxu1 %vm355_vm5, %v1946_v46 }
 0xf8f   :  { %3286 = vmatpush3.bf16.xpose.msk.msra.mxu1 %vm3818_vm4, %v3281_v33  ;;  %3149 = vmatprep.mubr.msk.f32.mxu1 %vm265_vm3, %v2045_v47 }
 0xf90   :  { %3167 = vmatprep.subr.bf16.mxu1 %v3526_v63 }
 0xf96   :  { %3150 = vmatmul.mubr.msk.f32.vlgmr.msra.gmra.mrb[28].mxu1 %vm265_vm3, %v2047_v48 }
 0xf97   :  { %3171 = vmatprep.mubr.msk.bf16.mxu1 %vm3527_vm2, %v3526_v63 }
0x1028   :  { %v3116_v49 = vpop.f32.mrb[22].mxu1 }
0x1029   :  { %1639 = vst.msk [vmem:[#allocation3 + $0x8] sm:$0xff] %vm265_vm3, %v3116_v49  ;;  %v1629_v50 = vpop.f32.mrb[23].mxu1 }
0x102a   :  { %1638 = vst.msk [vmem:[#allocation3] sm:$0xff] %vm265_vm3, %v1629_v50 }
0x1030   :  { %v3130_v51 = vpop.f32.mrb[24].mxu1 }
0x1031   :  { %v1823_v52 = vpop.f32.mrb[25].mxu1 }
0x1061   :  { %v3144_v40 = vpop.f32.mrb[26].mxu1 }
0x1062   :  { %v2025_v57 = vpop.f32.mrb[27].mxu1 }
0x1069   :  { %v3151_v59 = vpop.f32.mrb[28].mxu1 }
0x106a   :  { %v2132_v60 = vadd.f32 %v3151_v59, %v3846_v55  ;;  %v2126_v23 = vpop.f32.mrb[29].mxu1  ;;  %v3403_v59 = vld [vmem:[%s4232_s7 + $0x18] sm:$0xff]  }
0x106b   :  { %v2127_v61 = vadd.f32 %v2126_v23, %v3851_v56 }
0x106c   :  { %v2137_v62 = vmul.f32 1.442695, %v2132_v60 }
0x106d   :  { %v2135_v0 = vmul.f32 1.442695, %v2127_v61 }
0x106e   :  { %3486 = vpow2.f32 %v2137_v62 }
0x106f   :  { %3488 = vpow2.f32 %v2135_v0 }
0x1078   :  { %v3487_v1 = vpop.eup %3486 }
0x1079   :  { %v3489_v4 = vpop.eup %3488  ;;  %v2142_v6 = vsel %vm355_vm5, %v3487_v1, 0.0 }
0x107a   :  { %2143 = vadd.xlane.f32.xlu0 %v2142_v6  ;;  %v2139_v7 = vsel %vm355_vm5, %v3489_v4, 0.0  ;;  %v2345_v6 = vrot.slane %v4010_v58, %v3944_v18 }
0x107b   :  { %2140 = vadd.xlane.f32.xlu1 %v2139_v7 }
0x108c   :  { %1834 = vrot.lane.b32.xlu1 %v1823_v52, %s3538_s28 }
0x1090   :  { %3384 = vrot.lane.b32.xlu0 %v4018_v3, %s3539_s22  ;;  %1836 = vrot.lane.b32.xlu1 %v3130_v51, %s3538_s28 }
0x1094   :  { %2036 = vrot.lane.b32.xlu0 %v2025_v57, %s3540_s1  ;;  %2038 = vrot.lane.b32.xlu1 %v3144_v40, %s3540_s1 }
0x1107   :  { %v2144_v55 = vpop.xlane.xlu0 %2143 }
0x1108   :  { %3490 = vrcp.f32 %v2144_v55  ;;  %v2141_v56 = vpop.xlane.xlu1 %2140 }
0x1109   :  { %3492 = vrcp.f32 %v2141_v56 }
0x110b   :  { %v3385_v20 = vpop.permute.xlu0 %3384 }
0x110c   :  { %v3387_v21 = vunpack.i.h.bf16 %v3385_v20  ;;  %v3386_v10 = vunpack.i.l.bf16 %v3385_v20  ;;  %v1835_v11 = vpop.permute.xlu1 %1834 }
0x110d   :  { %1840 = vst.msk [vmem:[#allocation3] sm:$0xff] %vm655_vm6, %v1835_v11 }
0x110e   :  { %v3287_v12 = vpack.c.bf16 %v3387_v21, %v3386_v10  ;;  %v2351_v21 = vrot.slane %v4010_v58, %v3949_v25 }
0x110f   :  { %v2037_v13 = vpop.permute.xlu0 %2036 }
0x1110   :  { %2042 = vst.msk [vmem:[#allocation3] sm:$0xff] %vm858_vm7, %v2037_v13  ;;  %3288 = vmatprep.subr.bf16.mxu0 %v3287_v12  ;;  %v1837_v3 = vpop.permute.xlu1 %1836 }
0x1111   :  { %1841 = vst.msk [vmem:[#allocation3 + $0x8] sm:$0xff] %vm655_vm6, %v1837_v3  ;;  %3290 = vmatpush3.bf16.msra.mxu0 %v3287_v12  ;;  %v3404_v3 = vld [vmem:[%s4233_s8 + $0x20] sm:$0xff]  }
0x1112   :  { %v3491_v15 = vpop.eup %3490  ;;  %3159 = vmatprep.subr.bf16.mxu0 %v3526_v63 }
0x1113   :  { %v3493_v9 = vpop.eup %3492  ;;  %v2148_v19 = vmul.f32 %v3491_v15, %v3487_v1  ;;  %v3405_v15 = vld [vmem:[%s4233_s8 + $0x28] sm:$0xff]  }
0x1114   :  { %v2039_v16 = vpop.permute.xlu1 %2038  ;;  %v2147_v17 = vmul.f32 %v3493_v9, %v3489_v4  ;;  %v3406_v9 = vld [vmem:[%s4233_s8 + $0x30] sm:$0xff]  }
0x1115   :  { %2043 = vst.msk [vmem:[#allocation3 + $0x8] sm:$0xff] %vm858_vm7, %v2039_v16  ;;  %v3407_v16 = vld [vmem:[%s4233_s8 + $0x38] sm:$0xff]  }
0x1116   :  { %3156 = vmatprep.mubr.msk.f32.mxu0 %vm355_vm5, %v2147_v17  ;;  %v2363_v17 = vrot.slane %v4010_v58, %v3972_v39 }
0x1117   :  { %3157 = vmatmul.mubr.msk.f32.vlgmr.msra.gmra.mrb[20].mxu0 %vm355_vm5, %v2148_v19 }
0x1118   :  { %3163 = vmatprep.mubr.msk.bf16.mxu0 %vm3527_vm2, %v3526_v63  ;;  %3160 = vmatpush3.bf16.msra.mxu0 %v3400_v22 }
0x1119   :  { %3161 = vmatprep.subr.bf16.mxu0 %v3526_v63 }
0x111c   :  { %3162 = vmatpush3.bf16.msra.mxu0 %v3401_v24 }
0x111d   :  { %3175 = vmatprep.subr.bf16.mxu0 %v3526_v63 }
0x11ea   :  { %v3158_v26 = vpop.f32.mrb[20].mxu0 }
0x11eb   :  { %2240 = vrot.lane.b32.xlu1 %v3158_v26, %s3541_s12  ;;  %v2227_v2 = vpop.f32.mrb[21].mxu0 }
0x11ec   :  { %2238 = vrot.lane.b32.xlu0 %v2227_v2, %s3541_s12 }
0x125d   :  { %v2241_v27 = vpop.permute.xlu1 %2240 }
0x125e   :  { %2245 = vst.msk [vmem:[#allocation3 + $0x8] sm:$0xff] %vm1061_vm8, %v2241_v27  ;;  %v2239_v28 = vpop.permute.xlu0 %2238 }
0x125f   :  { %2244 = vst.msk [vmem:[#allocation3] sm:$0xff] %vm1061_vm8, %v2239_v28 }
0x1265   :  { %v2247_v29 = vld [vmem:[#allocation3 + $0x8] sm:$0xff] }
0x1266   :  { %v2246_v30 = vld [vmem:[#allocation3] sm:$0xff] }
0x1267   :  { %v2248_v35 = vpack.c.bf16 %v2247_v29, %v2246_v30 }
0x1269   :  { %3164 = vmatmul.mubr.msk.bf16.vlgmr.msra.gmra.mrb[24].mxu0 %vm149_vm1, %v2248_v35 }
0x126a   :  { %3183 = vmatprep.mubr.msk.bf16.mxu0 %vm3527_vm2, %v3526_v63  ;;  %3176 = vmatpush3.bf16.msra.mxu0 %v3404_v3 }
0x126b   :  { %3177 = vmatprep.subr.bf16.mxu0 %v3526_v63 }
0x126e   :  { %3178 = vmatpush3.bf16.msra.mxu0 %v3405_v15 }
0x126f   :  { %3179 = vmatprep.subr.bf16.mxu0 %v3526_v63 }
0x1272   :  { %3180 = vmatpush3.bf16.msra.mxu0 %v3406_v9 }
0x1273   :  { %3181 = vmatprep.subr.bf16.mxu0 %v3526_v63 }
0x1276   :  { %3182 = vmatpush3.bf16.msra.mxu0 %v3407_v16  ;;  %v2551_v16 = vrot.slane %v4010_v58, %v1366_v44  ;;  %v3410_v44 = vld [vmem:[%s4247_s30] sm:$0xff]  }
0x1277   :  { %3203 = vmatprep.subr.bf16.mxu0 %v3526_v63 }
0x133c   :  { %v2307_v34 = vpop.f32.mrb[24].mxu0 }
0x133d   :  { %v2308_v36 = vadd.f32 %v2307_v34, %v2257_v32  ;;  %v3165_v37 = vpop.f32.mrb[25].mxu0 }
0x133e   :  { %v2310_v38 = vpop.f32.mrb[26].mxu0 }
0x133f   :  { %v2311_v33 = vadd.f32 %v2310_v38, %v2257_v32  ;;  %v3166_v41 = vpop.f32.mrb[27].mxu0  ;;  %v2314_v42 = vadd.f32 %v2308_v36, %v4000_v53 }
0x1341   :  { %v2316_v43 = vsel %vm149_vm1, %v2314_v42, 0.0  ;;  %v2315_v45 = vadd.f32 %v2311_v33, %v4002_v54  ;;  %v3402_v54 = vld [vmem:[%s4232_s7 + $0x10] sm:$0xff]  }
0x1342   :  { %2317 = vadd.xlane.f32.xlu0 %v2316_v43  ;;  %3168 = vmatpush3.bf16.msra.mxu1 %v3402_v54 }
0x1343   :  { %v2319_v46 = vsel %vm149_vm1, %v2315_v45, 0.0  ;;  %3169 = vmatprep.subr.bf16.mxu1 %v3526_v63 }
0x1344   :  { %2320 = vadd.xlane.f32.xlu1 %v2319_v46 }
0x1346   :  { %3170 = vmatpush3.bf16.msra.mxu1 %v3403_v59 }
0x1347   :  { %3187 = vmatprep.subr.bf16.mxu1 %v3526_v63 }
0x13cf   :  { %v2318_v47 = vpop.xlane.xlu0 %2317 }
0x13d0   :  { %v2322_v48 = vmul.f32 0.03125, %v2318_v47 }
0x13d1   :  { %v2321_v49 = vpop.xlane.xlu1 %2320 }
0x13d2   :  { %v2324_v14 = vsub.f32 %v2314_v42, %v2322_v48  ;;  %v2323_v50 = vmul.f32 0.03125, %v2321_v49 }
0x13d4   :  { %v2325_v51 = vsub.f32 %v2315_v45, %v2323_v50  ;;  %v2326_v52 = vmul.f32 %v2324_v14, %v2324_v14  ;;  %v2451_v50 = vrot.slane %v4010_v58, %v1265_v5 }
0x13d6   :  { %v2328_v40 = vsel %vm149_vm1, %v2326_v52, 0.0  ;;  %v2327_v57 = vmul.f32 %v2325_v51, %v2325_v51 }
0x13d7   :  { %2329 = vadd.xlane.f32.xlu0 %v2328_v40 }
0x13d8   :  { %v2331_v53 = vsel %vm149_vm1, %v2327_v57, 0.0 }
0x13db   :  { %2332 = vadd.xlane.f32.xlu0 %v2331_v53 }
0x1464   :  { %v2330_v60 = vpop.xlane.xlu0 %2329 }
0x1465   :  { %v2334_v23 = vmul.f32 0.03125, %v2330_v60 }
0x1467   :  { %v2336_v61 = vadd.f32 1e-12, %v2334_v23 }
0x1468   :  { %v2333_v62 = vpop.xlane.xlu0 %2332 }
0x1469   :  { %3494 = vrsqrt.f32 %v2336_v61  ;;  %v2335_v0 = vmul.f32 0.03125, %v2333_v62 }
0x146b   :  { %v2337_v1 = vadd.f32 1e-12, %v2335_v0 }
0x146d   :  { %3496 = vrsqrt.f32 %v2337_v1 }
0x1473   :  { %v3495_v4 = vpop.eup %3494 }
0x1474   :  { %v2340_v7 = vmul.f32 %v3495_v4, %v2324_v14 }
0x1476   :  { %v2346_v56 = vmul.f32 %v2345_v6, %v2340_v7 }
0x1477   :  { %v3497_v55 = vpop.eup %3496 }
0x1478   :  { %v2341_v20 = vmul.f32 %v3497_v55, %v2325_v51  ;;  %v2352_v11 = vadd.f32 %v2351_v21, %v2346_v56 }
0x147a   :  { %v2347_v10 = vmul.f32 %v2345_v6, %v2341_v20 }
0x147c   :  { %v2353_v12 = vadd.f32 %v2351_v21, %v2347_v10  ;;  %v3408_v21 = vld [vmem:[%s4235_s10] sm:$0xff]   ;;  %v3409_v10 = vld [vmem:[%s4235_s10 + $0x8] sm:$0xff]  }
0x147e   :  { %v2354_v13 = vpack.c.bf16 %v2353_v12, %v2352_v11 }
0x1480   :  { %3172 = vmatmul.mubr.msk.bf16.vlgmr.msra.gmra.mrb[32].mxu1 %vm149_vm1, %v2354_v13 }
0x1481   :  { %3191 = vmatprep.mubr.msk.bf16.mxu1 %vm3527_vm2, %v3526_v63  ;;  %3188 = vmatpush3.bf16.msra.mxu1 %v3408_v21 }
0x1482   :  { %3189 = vmatprep.subr.bf16.mxu1 %v3526_v63 }
0x1485   :  { %3190 = vmatpush3.bf16.msra.mxu1 %v3409_v10 }
0x1486   :  { %3195 = vmatprep.subr.bf16.mxu1 %v3526_v63 }
0x1553   :  { %v2413_v19 = vpop.f32.mrb[32].mxu1 }
0x1554   :  { %v2414_v22 = vadd.f32 %v2413_v19, %v2363_v17  ;;  %v3173_v24 = vpop.f32.mrb[33].mxu1 }
0x1555   :  { %v2416_v26 = vpop.f32.mrb[34].mxu1 }
0x1556   :  { %v2422_v2 = vmul.f32 0.044715, %v2414_v22  ;;  %v2417_v27 = vadd.f32 %v2416_v26, %v2363_v17  ;;  %v3174_v28 = vpop.f32.mrb[35].mxu1  ;;  %v2420_v45 = vmul.f32 0.5, %v2414_v22 }
0x1558   :  { %v2424_v29 = vmul.f32 %v2422_v2, %v2414_v22  ;;  %v2423_v30 = vmul.f32 0.044715, %v2417_v27  ;;  %v2421_v46 = vmul.f32 0.5, %v2417_v27  ;;  %v2557_v2 = vrot.slane %v4010_v58, %v1372_v31  ;;  %v3510_v31 = vld [vmem:[%s4229_s4] sm:$0xff] }
0x1559   :  { %v2568_v58 = vrot.slane %v3510_v31, %v3944_v18  ;;  %v3413_v18 = vld [vmem:[%s4248_s26 + $0x8] sm:$0xff]  }
0x155a   :  { %v2426_v35 = vmul.f32 %v2424_v29, %v2414_v22  ;;  %v2425_v32 = vmul.f32 %v2423_v30, %v2417_v27 }
0x155c   :  { %v2428_v34 = vadd.f32 %v2426_v35, %v2414_v22  ;;  %v2427_v36 = vmul.f32 %v2425_v32, %v2417_v27 }
0x155e   :  { %v2430_v37 = vmul.f32 0.7978846, %v2428_v34  ;;  %v2429_v38 = vadd.f32 %v2427_v36, %v2417_v27 }
0x1560   :  { %3498 = vtanh.f32 %v2430_v37  ;;  %v2431_v33 = vmul.f32 0.7978846, %v2429_v38 }
0x1562   :  { %3500 = vtanh.f32 %v2431_v33 }
0x156a   :  { %v3499_v41 = vpop.eup %3498 }
0x156b   :  { %v2434_v42 = vadd.f32 1.0, %v3499_v41 }
0x156c   :  { %v3501_v43 = vpop.eup %3500 }
0x156d   :  { %v2435_v47 = vadd.f32 1.0, %v3501_v43  ;;  %v2436_v48 = vmul.f32 %v2434_v42, %v2420_v45  ;;  %v3412_v43 = vld [vmem:[%s4248_s26] sm:$0xff]   ;;  %v2635_v45 = vrot.slane %v3510_v31, %v3949_v25 }
0x156f   :  { %v2437_v49 = vmul.f32 %v2435_v47, %v2421_v46 }
0x1571   :  { %v2438_v14 = vpack.c.bf16 %v2437_v49, %v2436_v48 }
0x1573   :  { %3184 = vmatmul.mubr.msk.bf16.vlgmr.msra.gmra.mrb[28].mxu0 %vm1291_vm9, %v2438_v14 }
0x1574   :  { %3207 = vmatprep.mubr.msk.bf16.mxu0 %vm3527_vm2, %v3526_v63  ;;  %3204 = vmatpush3.bf16.msra.mxu0 %v3412_v43 }
0x1575   :  { %3205 = vmatprep.subr.bf16.mxu0 %v3526_v63 }
0x1578   :  { %3206 = vmatpush3.bf16.msra.mxu0 %v3413_v18 }
0x1646   :  { %v2513_v51 = vpop.f32.mrb[28].mxu0 }
0x1647   :  { %v2514_v52 = vadd.f32 %v2513_v51, %v2451_v50  ;;  %v3185_v40 = vpop.f32.mrb[29].mxu0 }
0x1648   :  { %v2516_v57 = vpop.f32.mrb[30].mxu0 }
0x1649   :  { %v2517_v53 = vadd.f32 %v2516_v57, %v2451_v50  ;;  %v3186_v54 = vpop.f32.mrb[31].mxu0  ;;  %v2520_v59 = vadd.f32 %v2514_v52, %v2352_v11 }
0x164b   :  { %v2522_v60 = vsel %vm149_vm1, %v2520_v59, 0.0  ;;  %v2521_v23 = vadd.f32 %v2517_v53, %v2353_v12 }
0x164c   :  { %2523 = vadd.xlane.f32.xlu0 %v2522_v60 }
0x164d   :  { %v2525_v61 = vsel %vm149_vm1, %v2521_v23, 0.0 }
0x164e   :  { %2526 = vadd.xlane.f32.xlu1 %v2525_v61 }
0x16d9   :  { %v2524_v62 = vpop.xlane.xlu0 %2523 }
0x16da   :  { %v2528_v0 = vmul.f32 0.03125, %v2524_v62 }
0x16db   :  { %v2527_v1 = vpop.xlane.xlu1 %2526 }
0x16dc   :  { %v2530_v4 = vsub.f32 %v2520_v59, %v2528_v0  ;;  %v2529_v6 = vmul.f32 0.03125, %v2527_v1 }
0x16de   :  { %v2531_v5 = vsub.f32 %v2521_v23, %v2529_v6  ;;  %v2532_v7 = vmul.f32 %v2530_v4, %v2530_v4 }
0x16e0   :  { %v2534_v55 = vsel %vm149_vm1, %v2532_v7, 0.0  ;;  %v2533_v56 = vmul.f32 %v2531_v5, %v2531_v5 }
0x16e1   :  { %2535 = vadd.xlane.f32.xlu0 %v2534_v55 }
0x16e2   :  { %v2537_v20 = vsel %vm149_vm1, %v2533_v56, 0.0 }
0x16e3   :  { %2538 = vadd.xlane.f32.xlu1 %v2537_v20 }
0x176e   :  { %v2536_v11 = vpop.xlane.xlu0 %2535 }
0x176f   :  { %v2540_v12 = vmul.f32 0.03125, %v2536_v11 }
0x1770   :  { %v2539_v13 = vpop.xlane.xlu1 %2538 }
0x1771   :  { %v2542_v3 = vadd.f32 1e-12, %v2540_v12  ;;  %v2541_v15 = vmul.f32 0.03125, %v2539_v13 }
0x1773   :  { %3502 = vrsqrt.f32 %v2542_v3  ;;  %v2543_v9 = vadd.f32 1e-12, %v2541_v15 }
0x1775   :  { %3504 = vrsqrt.f32 %v2543_v9 }
0x177d   :  { %v3503_v17 = vpop.eup %3502 }
0x177e   :  { %v2546_v19 = vmul.f32 %v3503_v17, %v2530_v4 }
0x177f   :  { %v3505_v22 = vpop.eup %3504 }
0x1780   :  { %v2552_v24 = vmul.f32 %v2551_v16, %v2546_v19  ;;  %v2547_v26 = vmul.f32 %v3505_v22, %v2531_v5 }
0x1782   :  { %v2553_v27 = vmul.f32 %v2551_v16, %v2547_v26  ;;  %v2558_v28 = vadd.f32 %v2557_v2, %v2552_v24 }
0x1784   :  { %v2559_v29 = vadd.f32 %v2557_v2, %v2553_v27 }
0x1786   :  { %v2560_v30 = vpack.c.bf16 %v2559_v29, %v2558_v28 }
0x1788   :  { %3192 = vmatmul.mubr.msk.bf16.vlgmr.msra.gmra.mrb[36].mxu1 %vm149_vm1, %v2560_v30 }
0x1789   :  { %3199 = vmatprep.mubr.msk.bf16.mxu1 %vm3527_vm2, %v3526_v63  ;;  %3196 = vmatpush3.bf16.msra.mxu1 %v3410_v44 }
0x178a   :  { %3197 = vmatprep.subr.bf16.mxu1 %v3526_v63  ;;  %v2702_v63 = vrot.slane %v3510_v31, %v3972_v39 }
0x178d   :  { %3198 = vmatpush3.bf16.msra.mxu1 %v3411_v8 }
0x185b   :  { %v2618_v35 = vpop.f32.mrb[36].mxu1 }
0x185c   :  { %v2619_v32 = vadd.f32 %v2618_v35, %v2568_v58  ;;  %v3193_v34 = vpop.f32.mrb[37].mxu1 }
0x185d   :  { %v2621_v36 = vpop.f32.mrb[38].mxu1 }
0x185e   :  { %v2622_v37 = vadd.f32 %v2621_v36, %v2568_v58  ;;  %v3194_v38 = vpop.f32.mrb[39].mxu1  ;;  %3506 = vtanh.f32 %v2619_v32 }
0x1860   :  { %3508 = vtanh.f32 %v2622_v37 }
0x1868   :  { %v3507_v33 = vpop.eup %3506 }
0x186a   :  { %v3509_v41 = vpop.eup %3508 }
0x186b   :  { %v2627_v42 = vpack.c.bf16 %v3509_v41, %v3507_v33 }
0x186d   :  { %3200 = vmatmul.mubr.msk.bf16.vlgmr.msra.gmra.mrb[40].mxu1 %vm149_vm1, %v2627_v42 }
0x1940   :  { %v2685_v46 = vpop.f32.mrb[40].mxu1 }
0x1941   :  { %v2686_v47 = vadd.f32 %v2685_v46, %v2635_v45  ;;  %v3201_v48 = vpop.f32.mrb[41].mxu1 }
0x1942   :  { %v2688_v49 = vpop.f32.mrb[42].mxu1 }
0x1943   :  { %v2689_v14 = vadd.f32 %v2688_v49, %v2635_v45  ;;  %v3202_v50 = vpop.f32.mrb[43].mxu1  ;;  %v2692_v51 = vmax.f32 %v2686_v47, 0.0 }
0x1945   :  { %v2693_v52 = vmax.f32 %v2689_v14, 0.0 }
0x1947   :  { %v2694_v40 = vpack.c.bf16 %v2693_v52, %v2692_v51 }
0x1949   :  { %3208 = vmatmul.mubr.msk.bf16.vlgmr.msra.gmra.mrb[32].mxu0 %vm149_vm1, %v2694_v40 }
0x1a1c   :  { %v2752_v57 = vpop.f32.mrb[32].mxu0 }
0x1a1d   :  { %v2753_v53 = vadd.f32 %v2752_v57, %v2702_v63  ;;  %v3209_v54 = vpop.f32.mrb[33].mxu0 }
0x1a1e   :  { %v2755_v59 = vpop.f32.mrb[34].mxu0 }
0x1a1f   :  { %2759 = vst [vmem:[%s4249_s16] sm:$0xff] %v2753_v53  ;;  %v2756_v25 = vadd.f32 %v2755_v59, %v2702_v63  ;;  %v3210_v60 = vpop.f32.mrb[35].mxu0 }
0x1a21   :  { %2760 = vst [vmem:[%s4249_s16 + $0x8] sm:$0xff] %v2756_v25 }

</bundles_post_ra>
